<compile_context>
chip_gen: v7x
topology: tpu7x:2x2x1
jax: 0.10.0
libtpu: 0.0.40
codegen_flags: <defaults>
</compile_context>

<pallas_src>
import functools

import jax
import jax.numpy as jnp
from jax import lax
from jax.experimental import pallas as pl
from jax.experimental.pallas import tpu as pltpu

LANE = 128                          # pad stored N dims to this for unmasked stores
_VMEM_LIMIT = 48 * 1024 * 1024      # safely under v7x's 64 MiB physical VMEM


def _round_up(n, m):
    return (n + m - 1) // m * m


def _full_spec(a):
    zeros = (0,) * a.ndim
    return pl.BlockSpec(a.shape, lambda i: zeros)


# ---------------------------------------------------------------------------
# Kernel 1: row-tiled fused GEMM + bias + ReLU  (conv1's im2col GEMM)
# ---------------------------------------------------------------------------
def _gemm_bias_relu_kernel(x_ref, w_ref, b_ref, o_ref):
    y = jnp.dot(x_ref[...], w_ref[...], preferred_element_type=jnp.float32)
    o_ref[...] = jnp.maximum(y + b_ref[...], 0.0).astype(o_ref.dtype)


def gemm_bias_relu(x, w, b, *, tile_m=128, out_dtype=jnp.bfloat16):
    """relu(x @ w + b).  x:(M,K) bf16, w:(K,N) bf16 (N % 128 == 0), b:(1,N) f32."""
    M, K = x.shape
    Kw, N = w.shape
    assert K == Kw and N % LANE == 0 and b.shape == (1, N)
    Mp = _round_up(M, tile_m)
    if Mp != M:
        x = jnp.pad(x, ((0, Mp - M), (0, 0)))
    out = pl.pallas_call(
        _gemm_bias_relu_kernel,
        out_shape=jax.ShapeDtypeStruct((Mp, N), out_dtype),
        grid=(Mp // tile_m,),
        in_specs=[
            pl.BlockSpec((tile_m, K), lambda i: (i, 0)),
            pl.BlockSpec((K, N), lambda i: (0, 0)),
            pl.BlockSpec((1, N), lambda i: (0, 0)),
        ],
        out_specs=pl.BlockSpec((tile_m, N), lambda i: (i, 0)),
        compiler_params=pltpu.CompilerParams(
            dimension_semantics=("parallel",),
            vmem_limit_bytes=_VMEM_LIMIT),
    )(x, w, b)
    return out[:M]


# ---------------------------------------------------------------------------
# Kernel 2: fused conv2 + conv3 + fc1 + fc2 head (one pallas_call, all
# intermediates stay in VMEM).  The per-tile conv2 patch slab has rows ordered
# (tap, batch-in-tile): conv2 is one GEMM and conv3's tap r is the contiguous,
# sublane-aligned row slab [r*tb, (r+1)*tb) of its result.
# ---------------------------------------------------------------------------
def _head_kernel(p2_ref, w2_ref, b2_ref, w3_ref, b3_ref,
                 w4_ref, b4_ref, w5_ref, b5_ref, o_ref, *, n_pos, tb):
    # conv2 + ReLU: a single MXU call over all n_pos*tb rows.
    h2 = jnp.dot(p2_ref[0], w2_ref[...], preferred_element_type=jnp.float32)
    h2 = jnp.maximum(h2 + b2_ref[...], 0.0).astype(jnp.bfloat16)
    # conv3: accumulate over its n_pos spatial taps (fully unrolled; 9 here).
    acc3 = jnp.zeros((tb, w3_ref.shape[2]), jnp.float32)
    for r in range(n_pos):
        acc3 = acc3 + jnp.dot(h2[r * tb:(r + 1) * tb], w3_ref[r],
                              preferred_element_type=jnp.float32)
    h3 = jnp.maximum(acc3 + b3_ref[...], 0.0).astype(jnp.bfloat16)     # conv3+ReLU
    h4 = jnp.dot(h3, w4_ref[...], preferred_element_type=jnp.float32)
    h4 = jnp.maximum(h4 + b4_ref[...], 0.0).astype(jnp.bfloat16)       # fc1+ReLU
    o_ref[...] = jnp.dot(h4, w5_ref[...],
                         preferred_element_type=jnp.float32) + b5_ref[...]  # fc2


def dqn_head(p2, w2, b2, w3, b3, w4, b4, w5, b5, *, tile_b=8):
    """p2: (B, n_pos, K2) bf16.  Returns (B, 128) f32 lane-padded Q-values."""
    B, n_pos, K2 = p2.shape
    n_out = w5.shape[1]
    Bp = _round_up(B, tile_b)
    if Bp != B:
        p2 = jnp.pad(p2, ((0, Bp - B), (0, 0), (0, 0)))
    nt = Bp // tile_b
    # Lay each batch tile out as one (n_pos*tile_b, K2) GEMM operand with rows
    # ordered (tap, batch-in-tile).  Done on the host (XLA) so the kernel needs
    # no reshapes/transposes.
    p2 = p2.reshape(nt, tile_b, n_pos, K2).transpose(0, 2, 1, 3).reshape(
        nt, n_pos * tile_b, K2)
    out = pl.pallas_call(
        functools.partial(_head_kernel, n_pos=n_pos, tb=tile_b),
        out_shape=jax.ShapeDtypeStruct((Bp, n_out), jnp.float32),
        grid=(nt,),
        in_specs=[pl.BlockSpec((1, n_pos * tile_b, K2), lambda i: (i, 0, 0)),
                  _full_spec(w2), _full_spec(b2), _full_spec(w3), _full_spec(b3),
                  _full_spec(w4), _full_spec(b4), _full_spec(w5), _full_spec(b5)],
        out_specs=pl.BlockSpec((tile_b, n_out), lambda i: (i, 0)),
        compiler_params=pltpu.CompilerParams(
            dimension_semantics=("parallel",),
            vmem_limit_bytes=_VMEM_LIMIT),
    )(p2, w2, b2, w3, b3, w4, b4, w5, b5)
    return out[:B]


# ---------------------------------------------------------------------------
# Host-side patch extraction: loops over the k*k kernel taps only.
# ---------------------------------------------------------------------------
def extract_patches_nhwc(x, k, s):
    """x:(B,H,W,C) -> (B,Ho,Wo,k*k*C); feature order (kh, kw, c)."""
    B, H, W, C = x.shape
    Ho = (H - k) // s + 1
    Wo = (W - k) // s + 1
    taps = []
    for kh in range(k):
        for kw in range(k):
            taps.append(x[:, kh:kh + s * (Ho - 1) + 1:s,
                          kw:kw + s * (Wo - 1) + 1:s, :])
    return jnp.concatenate(taps, axis=-1), Ho, Wo


# ---------------------------------------------------------------------------
# Forward pass
# ---------------------------------------------------------------------------
def dqn_forward(params, x, *, output_dim):
    """x: (B, Cin, H, W) float32 in [0, 255] (PyTorch NCHW convention)."""
    x = jnp.transpose(x, (0, 2, 3, 1)).astype(jnp.bfloat16)    # NHWC, once
    B = x.shape[0]

    # conv1 (8x8, stride 4) + ReLU as one row-tiled GEMM; /255 folded into w1.
    p1, H1, W1 = extract_patches_nhwc(x, 8, 4)
    h1 = gemm_bias_relu(p1.reshape(B * H1 * W1, -1), params["w1"], params["b1"])
    h1 = h1.reshape(B, H1, W1, LANE)[..., :32]                 # drop lane padding

    # conv2 patches (4x4, stride 2); positions row-major (h2, w2).
    p2, H2, W2 = extract_patches_nhwc(h1, 4, 2)
    assert (H2 - 3 + 1) * (W2 - 3 + 1) == 1, "fused head assumes 1x1 conv3 output"
    p2 = p2.reshape(B, H2 * W2, -1)                            # (B, 9, 512)

    q = dqn_head(p2, params["w2"], params["b2"], params["w3"], params["b3"],
                 params["w4"], params["b4"], params["w5"], params["b5"])
    return q[:, :output_dim]


# ---------------------------------------------------------------------------
# Pure-JAX f32 reference (same math as the PyTorch module) for validation.
# ---------------------------------------------------------------------------
def dqn_reference(tp, x, *, output_dim):
    dn = ("NCHW", "OIHW", "NCHW")
    h = x.astype(jnp.float32) / 255.0
    h = jax.nn.relu(lax.conv_general_dilated(h, tp["c1_w"], (4, 4), "VALID",
                                             dimension_numbers=dn)
                    + tp["c1_b"][None, :, None, None])
    h = jax.nn.relu(lax.conv_general_dilated(h, tp["c2_w"], (2, 2), "VALID",
                                             dimension_numbers=dn)
                    + tp["c2_b"][None, :, None, None])
    h = jax.nn.relu(lax.conv_general_dilated(h, tp["c3_w"], (1, 1), "VALID",
                                             dimension_numbers=dn)
                    + tp["c3_b"][None, :, None, None])
    h = h.reshape(h.shape[0], -1)                              # NCHW flatten
    h = jax.nn.relu(h @ tp["fc1_w"].T + tp["fc1_b"])
    return h @ tp["fc2_w"].T + tp["fc2_b"]


# ---------------------------------------------------------------------------
# Parameter init (PyTorch layouts) + one-time repack into kernel layouts
# ---------------------------------------------------------------------------
def _conv_gemm_weight(w, scale=1.0, n_pad=None):
    """torch (Cout,Cin,kh,kw) -> (kh*kw*Cin, Cout[_padded]) bf16; row order
    (kh, kw, c) matches extract_patches_nhwc."""
    cout, cin, kh, kw = w.shape
    m = (w * scale).transpose(2, 3, 1, 0).reshape(kh * kw * cin, cout)
    if n_pad is not None and n_pad > cout:
        m = jnp.pad(m, ((0, 0), (0, n_pad - cout)))
    return m.astype(jnp.bfloat16)


def pack_params(tp, output_dim):
    w3 = tp["c3_w"]                                     # (64, 64, 3, 3)
    n_taps = w3.shape[2] * w3.shape[3]
    return {
        # x/255 folded into conv1's weights (conv is linear in x).
        "w1": _conv_gemm_weight(tp["c1_w"], scale=1.0 / 255.0, n_pad=LANE),
        "b1": jnp.pad(tp["c1_b"], (0, LANE - tp["c1_b"].shape[0])).reshape(1, -1),
        "w2": _conv_gemm_weight(tp["c2_w"]),            # (512, 64)
        "b2": tp["c2_b"].reshape(1, -1),
        # conv3 split per spatial tap: (taps, Cin, Cout); tap order (kh, kw).
        "w3": w3.transpose(2, 3, 1, 0).reshape(
            n_taps, w3.shape[1], w3.shape[0]).astype(jnp.bfloat16),
        "b3": tp["c3_b"].reshape(1, -1),
        # fc weights -> (in, out); flatten order == channel order since conv3's
        # output is 1x1 spatial here.
        "w4": tp["fc1_w"].T.astype(jnp.bfloat16),       # (64, 512)
        "b4": tp["fc1_b"].reshape(1, -1),
        # fc2 padded to a lane-dense 128-wide output; sliced back on the host.
        "w5": jnp.pad(tp["fc2_w"].T,
                      ((0, 0), (0, LANE - output_dim))).astype(jnp.bfloat16),
        "b5": jnp.pad(tp["fc2_b"], (0, LANE - output_dim)).reshape(1, -1),
    }


def init_torch_params(key, input_dim, output_dim):
    C, H, W = input_dim
    H1, W1 = (H - 8) // 4 + 1, (W - 8) // 4 + 1
    H2, W2 = (H1 - 4) // 2 + 1, (W1 - 4) // 2 + 1
    H3, W3 = H2 - 3 + 1, W2 - 3 + 1
    conv_out = 64 * H3 * W3
    ks = jax.random.split(key, 10)
    s = 0.05
    return {
        "c1_w": s * jax.random.normal(ks[0], (32, C, 8, 8), jnp.float32),
        "c1_b": s * jax.random.normal(ks[1], (32,), jnp.float32),
        "c2_w": s * jax.random.normal(ks[2], (64, 32, 4, 4), jnp.float32),
        "c2_b": s * jax.random.normal(ks[3], (64,), jnp.float32),
        "c3_w": s * jax.random.normal(ks[4], (64, 64, 3, 3), jnp.float32),
        "c3_b": s * jax.random.normal(ks[5], (64,), jnp.float32),
        "fc1_w": s * jax.random.normal(ks[6], (512, conv_out), jnp.float32),
        "fc1_b": s * jax.random.normal(ks[7], (512,), jnp.float32),
        "fc2_w": s * jax.random.normal(ks[8], (output_dim, 512), jnp.float32),
        "fc2_b": s * jax.random.normal(ks[9], (output_dim,), jnp.float32),
    }


if __name__ == "__main__":
    input_dim = (4, 36, 36)     # (C, H, W): spatial 36 -> 8 -> 3 -> 1
    output_dim = 6
    batch = 4                   # exercises multi-block conv1 grid + batch padding

    key = jax.random.PRNGKey(0)
    kx, kp = jax.random.split(key)
    x = jax.random.uniform(kx, (batch,) + input_dim, jnp.float32,
                           minval=0.0, maxval=255.0)
    tp = init_torch_params(kp, input_dim, output_dim)
    params = pack_params(tp, output_dim)

    fwd = jax.jit(functools.partial(dqn_forward, output_dim=output_dim))
    q_values = jax.block_until_ready(fwd(params, x))
    assert q_values.shape == (batch, output_dim), q_values.shape
    assert jnp.all(jnp.isfinite(q_values))

    # Validate against the pure-JAX f32 reference (bf16 operands -> loose tol).
    q_ref = jax.block_until_ready(
        jax.jit(functools.partial(dqn_reference, output_dim=output_dim))(tp, x))
    assert jnp.allclose(q_values, q_ref, rtol=5e-2, atol=3e-2), \
        float(jnp.max(jnp.abs(q_values - q_ref)))

    print("KERNEL_OK")
</pallas_src>

<mosaic_0001>
module attributes {stable_mosaic.version = 11 : i64} {
  func.func @_gemm_bias_relu_kernel(%arg0: i32, %arg1: memref<128x256xbf16, #tpu.memory_space<vmem>>, %arg2: memref<256x128xbf16, #tpu.memory_space<vmem>>, %arg3: memref<1x128xf32, #tpu.memory_space<vmem>>, %arg4: memref<128x128xbf16, #tpu.memory_space<vmem>>) attributes {dimension_semantics = [#tpu.dimension_semantics<parallel>], iteration_bounds = array<i64: 2>, scalar_prefetch = 0 : i64, scratch_operands = 0 : i64, tpu.core_type = #tpu.core_type<tc>, window_params = [{transform_indices = @transform_0, window_bounds = array<i64: 128, 256>}, {pipeline_mode = #tpu.pipeline_mode<synchronous>, transform_indices = @transform_1, window_bounds = array<i64: 256, 128>}, {pipeline_mode = #tpu.pipeline_mode<synchronous>, transform_indices = @transform_2, window_bounds = array<i64: 1, 128>}, {transform_indices = @transform_3, window_bounds = array<i64: 128, 128>}]} {
    %c0 = arith.constant 0 : index
    %c0_0 = arith.constant 0 : index
    %0 = vector.load %arg1[%c0, %c0_0] : memref<128x256xbf16, #tpu.memory_space<vmem>>, vector<128x256xbf16>
    %c0_1 = arith.constant 0 : index
    %c0_2 = arith.constant 0 : index
    %1 = vector.load %arg2[%c0_1, %c0_2] : memref<256x128xbf16, #tpu.memory_space<vmem>>, vector<256x128xbf16>
    %cst = arith.constant dense<0.000000e+00> : vector<128x128xf32>
    %2 = tpu.matmul %0, %1, %cst {dimension_numbers = #tpu.dot_dimension_numbers<[1], [0], [0], [1], [0, 0, 1, 1], [], []>} : vector<128x256xbf16>, vector<256x128xbf16>, vector<128x128xf32> -> vector<128x128xf32>
    %c0_3 = arith.constant 0 : index
    %c0_4 = arith.constant 0 : index
    %3 = vector.load %arg3[%c0_3, %c0_4] : memref<1x128xf32, #tpu.memory_space<vmem>>, vector<1x128xf32>
    %4 = vector.broadcast %3 : vector<1x128xf32> to vector<128x128xf32>
    %5 = arith.addf %2, %4 : vector<128x128xf32>
    %cst_5 = arith.constant 0.000000e+00 : f32
    %6 = vector.broadcast %cst_5 : f32 to vector<128x128xf32>
    %7 = arith.maximumf %5, %6 : vector<128x128xf32>
    %8 = arith.truncf %7 : vector<128x128xf32> to vector<128x128xbf16>
    %c0_6 = arith.constant 0 : index
    %c0_7 = arith.constant 0 : index
    %9 = vector.load %arg4[%c0_6, %c0_7] : memref<128x128xbf16, #tpu.memory_space<vmem>>, vector<128x128xbf16>
    tpu.vector_store %arg4[%c0_6, %c0_7], %8 {strides = array<i32>} : memref<128x128xbf16, #tpu.memory_space<vmem>>, vector<128x128xbf16>,
    return
  }
  func.func @transform_0(%arg0: i32) -> (i32, i32) {
    %c0_i32 = arith.constant 0 : i32
    %c0_i32_0 = arith.constant 0 : i32
    return %arg0, %c0_i32 : i32, i32
  }
  func.func @transform_1(%arg0: i32) -> (i32, i32) {
    %c0_i32 = arith.constant 0 : i32
    %c0_i32_0 = arith.constant 0 : i32
    %c0_i32_1 = arith.constant 0 : i32
    return %c0_i32, %c0_i32_0 : i32, i32
  }
  func.func @transform_2(%arg0: i32) -> (i32, i32) {
    %c0_i32 = arith.constant 0 : i32
    %c0_i32_0 = arith.constant 0 : i32
    %c0_i32_1 = arith.constant 0 : i32
    return %c0_i32, %c0_i32_0 : i32, i32
  }
  func.func @transform_3(%arg0: i32) -> (i32, i32) {
    %c0_i32 = arith.constant 0 : i32
    %c0_i32_0 = arith.constant 0 : i32
    return %arg0, %c0_i32 : i32, i32
  }
}

module attributes {stable_mosaic.version = 11 : i64} {
  func.func @_head_kernel(%arg0: i32, %arg1: memref<1x72x512xbf16, #tpu.memory_space<vmem>>, %arg2: memref<512x64xbf16, #tpu.memory_space<vmem>>, %arg3: memref<1x64xf32, #tpu.memory_space<vmem>>, %arg4: memref<9x64x64xbf16, #tpu.memory_space<vmem>>, %arg5: memref<1x64xf32, #tpu.memory_space<vmem>>, %arg6: memref<64x512xbf16, #tpu.memory_space<vmem>>, %arg7: memref<1x512xf32, #tpu.memory_space<vmem>>, %arg8: memref<512x128xbf16, #tpu.memory_space<vmem>>, %arg9: memref<1x128xf32, #tpu.memory_space<vmem>>, %arg10: memref<8x128xf32, #tpu.memory_space<vmem>>) attributes {dimension_semantics = [#tpu.dimension_semantics<parallel>], iteration_bounds = array<i64: 1>, scalar_prefetch = 0 : i64, scratch_operands = 0 : i64, tpu.core_type = #tpu.core_type<tc>, window_params = [{transform_indices = @transform_0, window_bounds = array<i64: 1, 72, 512>}, {pipeline_mode = #tpu.pipeline_mode<synchronous>, transform_indices = @transform_1, window_bounds = array<i64: 512, 64>}, {pipeline_mode = #tpu.pipeline_mode<synchronous>, transform_indices = @transform_2, window_bounds = array<i64: 1, 64>}, {pipeline_mode = #tpu.pipeline_mode<synchronous>, transform_indices = @transform_3, window_bounds = array<i64: 9, 64, 64>}, {pipeline_mode = #tpu.pipeline_mode<synchronous>, transform_indices = @transform_4, window_bounds = array<i64: 1, 64>}, {pipeline_mode = #tpu.pipeline_mode<synchronous>, transform_indices = @transform_5, window_bounds = array<i64: 64, 512>}, {pipeline_mode = #tpu.pipeline_mode<synchronous>, transform_indices = @transform_6, window_bounds = array<i64: 1, 512>}, {pipeline_mode = #tpu.pipeline_mode<synchronous>, transform_indices = @transform_7, window_bounds = array<i64: 512, 128>}, {pipeline_mode = #tpu.pipeline_mode<synchronous>, transform_indices = @transform_8, window_bounds = array<i64: 1, 128>}, {transform_indices = @transform_9, window_bounds = array<i64: 8, 128>}]} {
    %c0 = arith.constant 0 : index
    %c0_0 = arith.constant 0 : index
    %c0_1 = arith.constant 0 : index
    %0 = vector.load %arg1[%c0, %c0_0, %c0_1] : memref<1x72x512xbf16, #tpu.memory_space<vmem>>, vector<1x72x512xbf16>
    %1 = vector.shape_cast %0 : vector<1x72x512xbf16> to vector<72x512xbf16>
    %c0_2 = arith.constant 0 : index
    %c0_3 = arith.constant 0 : index
    %2 = vector.load %arg2[%c0_2, %c0_3] : memref<512x64xbf16, #tpu.memory_space<vmem>>, vector<512x64xbf16>
    %cst = arith.constant dense<0.000000e+00> : vector<72x64xf32>
    %3 = tpu.matmul %1, %2, %cst {dimension_numbers = #tpu.dot_dimension_numbers<[1], [0], [0], [1], [0, 0, 1, 1], [], []>} : vector<72x512xbf16>, vector<512x64xbf16>, vector<72x64xf32> -> vector<72x64xf32>
    %c0_4 = arith.constant 0 : index
    %c0_5 = arith.constant 0 : index
    %4 = vector.load %arg3[%c0_4, %c0_5] : memref<1x64xf32, #tpu.memory_space<vmem>>, vector<1x64xf32>
    %5 = vector.broadcast %4 : vector<1x64xf32> to vector<72x64xf32>
    %6 = arith.addf %3, %5 : vector<72x64xf32>
    %cst_6 = arith.constant 0.000000e+00 : f32
    %7 = vector.broadcast %cst_6 : f32 to vector<72x64xf32>
    %8 = arith.maximumf %6, %7 : vector<72x64xf32>
    %9 = arith.truncf %8 : vector<72x64xf32> to vector<72x64xbf16>
    %cst_7 = arith.constant 0.000000e+00 : f32
    %10 = vector.broadcast %cst_7 : f32 to vector<8x64xf32>
    %11 = vector.extract_strided_slice %9 {offsets = [0, 0], sizes = [8, 64], strides = [1, 1]} : vector<72x64xbf16> to vector<8x64xbf16>
    %c0_8 = arith.constant 0 : index
    %c0_9 = arith.constant 0 : index
    %c0_10 = arith.constant 0 : index
    %12 = vector.load %arg4[%c0_8, %c0_9, %c0_10] : memref<9x64x64xbf16, #tpu.memory_space<vmem>>, vector<1x64x64xbf16>
    %13 = vector.shape_cast %12 : vector<1x64x64xbf16> to vector<64x64xbf16>
    %cst_11 = arith.constant dense<0.000000e+00> : vector<8x64xf32>
    %14 = tpu.matmul %11, %13, %cst_11 {dimension_numbers = #tpu.dot_dimension_numbers<[1], [0], [0], [1], [0, 0, 1, 1], [], []>} : vector<8x64xbf16>, vector<64x64xbf16>, vector<8x64xf32> -> vector<8x64xf32>
    %15 = arith.addf %10, %14 : vector<8x64xf32>
    %16 = vector.extract_strided_slice %9 {offsets = [8, 0], sizes = [8, 64], strides = [1, 1]} : vector<72x64xbf16> to vector<8x64xbf16>
    %c1 = arith.constant 1 : index
    %c0_12 = arith.constant 0 : index
    %c0_13 = arith.constant 0 : index
    %17 = vector.load %arg4[%c1, %c0_12, %c0_13] : memref<9x64x64xbf16, #tpu.memory_space<vmem>>, vector<1x64x64xbf16>
    %18 = vector.shape_cast %17 : vector<1x64x64xbf16> to vector<64x64xbf16>
    %cst_14 = arith.constant dense<0.000000e+00> : vector<8x64xf32>
    %19 = tpu.matmul %16, %18, %cst_14 {dimension_numbers = #tpu.dot_dimension_numbers<[1], [0], [0], [1], [0, 0, 1, 1], [], []>} : vector<8x64xbf16>, vector<64x64xbf16>, vector<8x64xf32> -> vector<8x64xf32>
    %20 = arith.addf %15, %19 : vector<8x64xf32>
    %21 = vector.extract_strided_slice %9 {offsets = [16, 0], sizes = [8, 64], strides = [1, 1]} : vector<72x64xbf16> to vector<8x64xbf16>
    %c2 = arith.constant 2 : index
    %c0_15 = arith.constant 0 : index
    %c0_16 = arith.constant 0 : index
    %22 = vector.load %arg4[%c2, %c0_15, %c0_16] : memref<9x64x64xbf16, #tpu.memory_space<vmem>>, vector<1x64x64xbf16>
    %23 = vector.shape_cast %22 : vector<1x64x64xbf16> to vector<64x64xbf16>
    %cst_17 = arith.constant dense<0.000000e+00> : vector<8x64xf32>
    %24 = tpu.matmul %21, %23, %cst_17 {dimension_numbers = #tpu.dot_dimension_numbers<[1], [0], [0], [1], [0, 0, 1, 1], [], []>} : vector<8x64xbf16>, vector<64x64xbf16>, vector<8x64xf32> -> vector<8x64xf32>
    %25 = arith.addf %20, %24 : vector<8x64xf32>
    %26 = vector.extract_strided_slice %9 {offsets = [24, 0], sizes = [8, 64], strides = [1, 1]} : vector<72x64xbf16> to vector<8x64xbf16>
    %c3 = arith.constant 3 : index
    %c0_18 = arith.constant 0 : index
    %c0_19 = arith.constant 0 : index
    %27 = vector.load %arg4[%c3, %c0_18, %c0_19] : memref<9x64x64xbf16, #tpu.memory_space<vmem>>, vector<1x64x64xbf16>
    %28 = vector.shape_cast %27 : vector<1x64x64xbf16> to vector<64x64xbf16>
    %cst_20 = arith.constant dense<0.000000e+00> : vector<8x64xf32>
    %29 = tpu.matmul %26, %28, %cst_20 {dimension_numbers = #tpu.dot_dimension_numbers<[1], [0], [0], [1], [0, 0, 1, 1], [], []>} : vector<8x64xbf16>, vector<64x64xbf16>, vector<8x64xf32> -> vector<8x64xf32>
    %30 = arith.addf %25, %29 : vector<8x64xf32>
    %31 = vector.extract_strided_slice %9 {offsets = [32, 0], sizes = [8, 64], strides = [1, 1]} : vector<72x64xbf16> to vector<8x64xbf16>
    %c4 = arith.constant 4 : index
    %c0_21 = arith.constant 0 : index
    %c0_22 = arith.constant 0 : index
    %32 = vector.load %arg4[%c4, %c0_21, %c0_22] : memref<9x64x64xbf16, #tpu.memory_space<vmem>>, vector<1x64x64xbf16>
    %33 = vector.shape_cast %32 : vector<1x64x64xbf16> to vector<64x64xbf16>
    %cst_23 = arith.constant dense<0.000000e+00> : vector<8x64xf32>
    %34 = tpu.matmul %31, %33, %cst_23 {dimension_numbers = #tpu.dot_dimension_numbers<[1], [0], [0], [1], [0, 0, 1, 1], [], []>} : vector<8x64xbf16>, vector<64x64xbf16>, vector<8x64xf32> -> vector<8x64xf32>
    %35 = arith.addf %30, %34 : vector<8x64xf32>
    %36 = vector.extract_strided_slice %9 {offsets = [40, 0], sizes = [8, 64], strides = [1, 1]} : vector<72x64xbf16> to vector<8x64xbf16>
    %c5 = arith.constant 5 : index
    %c0_24 = arith.constant 0 : index
    %c0_25 = arith.constant 0 : index
    %37 = vector.load %arg4[%c5, %c0_24, %c0_25] : memref<9x64x64xbf16, #tpu.memory_space<vmem>>, vector<1x64x64xbf16>
    %38 = vector.shape_cast %37 : vector<1x64x64xbf16> to vector<64x64xbf16>
    %cst_26 = arith.constant dense<0.000000e+00> : vector<8x64xf32>
    %39 = tpu.matmul %36, %38, %cst_26 {dimension_numbers = #tpu.dot_dimension_numbers<[1], [0], [0], [1], [0, 0, 1, 1], [], []>} : vector<8x64xbf16>, vector<64x64xbf16>, vector<8x64xf32> -> vector<8x64xf32>
    %40 = arith.addf %35, %39 : vector<8x64xf32>
    %41 = vector.extract_strided_slice %9 {offsets = [48, 0], sizes = [8, 64], strides = [1, 1]} : vector<72x64xbf16> to vector<8x64xbf16>
    %c6 = arith.constant 6 : index
    %c0_27 = arith.constant 0 : index
    %c0_28 = arith.constant 0 : index
    %42 = vector.load %arg4[%c6, %c0_27, %c0_28] : memref<9x64x64xbf16, #tpu.memory_space<vmem>>, vector<1x64x64xbf16>
    %43 = vector.shape_cast %42 : vector<1x64x64xbf16> to vector<64x64xbf16>
    %cst_29 = arith.constant dense<0.000000e+00> : vector<8x64xf32>
    %44 = tpu.matmul %41, %43, %cst_29 {dimension_numbers = #tpu.dot_dimension_numbers<[1], [0], [0], [1], [0, 0, 1, 1], [], []>} : vector<8x64xbf16>, vector<64x64xbf16>, vector<8x64xf32> -> vector<8x64xf32>
    %45 = arith.addf %40, %44 : vector<8x64xf32>
    %46 = vector.extract_strided_slice %9 {offsets = [56, 0], sizes = [8, 64], strides = [1, 1]} : vector<72x64xbf16> to vector<8x64xbf16>
    %c7 = arith.constant 7 : index
    %c0_30 = arith.constant 0 : index
    %c0_31 = arith.constant 0 : index
    %47 = vector.load %arg4[%c7, %c0_30, %c0_31] : memref<9x64x64xbf16, #tpu.memory_space<vmem>>, vector<1x64x64xbf16>
    %48 = vector.shape_cast %47 : vector<1x64x64xbf16> to vector<64x64xbf16>
    %cst_32 = arith.constant dense<0.000000e+00> : vector<8x64xf32>
    %49 = tpu.matmul %46, %48, %cst_32 {dimension_numbers = #tpu.dot_dimension_numbers<[1], [0], [0], [1], [0, 0, 1, 1], [], []>} : vector<8x64xbf16>, vector<64x64xbf16>, vector<8x64xf32> -> vector<8x64xf32>
    %50 = arith.addf %45, %49 : vector<8x64xf32>
    %51 = vector.extract_strided_slice %9 {offsets = [64, 0], sizes = [8, 64], strides = [1, 1]} : vector<72x64xbf16> to vector<8x64xbf16>
    %c8 = arith.constant 8 : index
    %c0_33 = arith.constant 0 : index
    %c0_34 = arith.constant 0 : index
    %52 = vector.load %arg4[%c8, %c0_33, %c0_34] : memref<9x64x64xbf16, #tpu.memory_space<vmem>>, vector<1x64x64xbf16>
    %53 = vector.shape_cast %52 : vector<1x64x64xbf16> to vector<64x64xbf16>
    %cst_35 = arith.constant dense<0.000000e+00> : vector<8x64xf32>
    %54 = tpu.matmul %51, %53, %cst_35 {dimension_numbers = #tpu.dot_dimension_numbers<[1], [0], [0], [1], [0, 0, 1, 1], [], []>} : vector<8x64xbf16>, vector<64x64xbf16>, vector<8x64xf32> -> vector<8x64xf32>
    %55 = arith.addf %50, %54 : vector<8x64xf32>
    %c0_36 = arith.constant 0 : index
    %c0_37 = arith.constant 0 : index
    %56 = vector.load %arg5[%c0_36, %c0_37] : memref<1x64xf32, #tpu.memory_space<vmem>>, vector<1x64xf32>
    %57 = vector.broadcast %56 : vector<1x64xf32> to vector<8x64xf32>
    %58 = arith.addf %55, %57 : vector<8x64xf32>
    %cst_38 = arith.constant 0.000000e+00 : f32
    %59 = vector.broadcast %cst_38 : f32 to vector<8x64xf32>
    %60 = arith.maximumf %58, %59 : vector<8x64xf32>
    %61 = arith.truncf %60 : vector<8x64xf32> to vector<8x64xbf16>
    %c0_39 = arith.constant 0 : index
    %c0_40 = arith.constant 0 : index
    %62 = vector.load %arg6[%c0_39, %c0_40] : memref<64x512xbf16, #tpu.memory_space<vmem>>, vector<64x512xbf16>
    %cst_41 = arith.constant dense<0.000000e+00> : vector<8x512xf32>
    %63 = tpu.matmul %61, %62, %cst_41 {dimension_numbers = #tpu.dot_dimension_numbers<[1], [0], [0], [1], [0, 0, 1, 1], [], []>} : vector<8x64xbf16>, vector<64x512xbf16>, vector<8x512xf32> -> vector<8x512xf32>
    %c0_42 = arith.constant 0 : index
    %c0_43 = arith.constant 0 : index
    %64 = vector.load %arg7[%c0_42, %c0_43] : memref<1x512xf32, #tpu.memory_space<vmem>>, vector<1x512xf32>
    %65 = vector.broadcast %64 : vector<1x512xf32> to vector<8x512xf32>
    %66 = arith.addf %63, %65 : vector<8x512xf32>
    %cst_44 = arith.constant 0.000000e+00 : f32
    %67 = vector.broadcast %cst_44 : f32 to vector<8x512xf32>
    %68 = arith.maximumf %66, %67 : vector<8x512xf32>
    %69 = arith.truncf %68 : vector<8x512xf32> to vector<8x512xbf16>
    %c0_45 = arith.constant 0 : index
    %c0_46 = arith.constant 0 : index
    %70 = vector.load %arg8[%c0_45, %c0_46] : memref<512x128xbf16, #tpu.memory_space<vmem>>, vector<512x128xbf16>
    %cst_47 = arith.constant dense<0.000000e+00> : vector<8x128xf32>
    %71 = tpu.matmul %69, %70, %cst_47 {dimension_numbers = #tpu.dot_dimension_numbers<[1], [0], [0], [1], [0, 0, 1, 1], [], []>} : vector<8x512xbf16>, vector<512x128xbf16>, vector<8x128xf32> -> vector<8x128xf32>
    %c0_48 = arith.constant 0 : index
    %c0_49 = arith.constant 0 : index
    %72 = vector.load %arg9[%c0_48, %c0_49] : memref<1x128xf32, #tpu.memory_space<vmem>>, vector<1x128xf32>
    %73 = vector.broadcast %72 : vector<1x128xf32> to vector<8x128xf32>
    %74 = arith.addf %71, %73 : vector<8x128xf32>
    %c0_50 = arith.constant 0 : index
    %c0_51 = arith.constant 0 : index
    %75 = vector.load %arg10[%c0_50, %c0_51] : memref<8x128xf32, #tpu.memory_space<vmem>>, vector<8x128xf32>
    tpu.vector_store %arg10[%c0_50, %c0_51], %74 {strides = array<i32>} : memref<8x128xf32, #tpu.memory_space<vmem>>, vector<8x128xf32>,
    return
  }
  func.func @transform_0(%arg0: i32) -> (i32, i32, i32) {
    %c0_i32 = arith.constant 0 : i32
    %c0_i32_0 = arith.constant 0 : i32
    %c0_i32_1 = arith.constant 0 : i32
    return %arg0, %c0_i32, %c0_i32_0 : i32, i32, i32
  }
  func.func @transform_1(%arg0: i32) -> (i32, i32) {
    %c0_i32 = arith.constant 0 : i32
    %c0_i32_0 = arith.constant 0 : i32
    %c0_i32_1 = arith.constant 0 : i32
    return %c0_i32, %c0_i32_0 : i32, i32
  }
  func.func @transform_2(%arg0: i32) -> (i32, i32) {
    %c0_i32 = arith.constant 0 : i32
    %c0_i32_0 = arith.constant 0 : i32
    %c0_i32_1 = arith.constant 0 : i32
    return %c0_i32, %c0_i32_0 : i32, i32
  }
  func.func @transform_3(%arg0: i32) -> (i32, i32, i32) {
    %c0_i32 = arith.constant 0 : i32
    %c0_i32_0 = arith.constant 0 : i32
    %c0_i32_1 = arith.constant 0 : i32
    %c0_i32_2 = arith.constant 0 : i32
    return %c0_i32, %c0_i32_0, %c0_i32_1 : i32, i32, i32
  }
  func.func @transform_4(%arg0: i32) -> (i32, i32) {
    %c0_i32 = arith.constant 0 : i32
    %c0_i32_0 = arith.constant 0 : i32
    %c0_i32_1 = arith.constant 0 : i32
    return %c0_i32, %c0_i32_0 : i32, i32
  }
  func.func @transform_5(%arg0: i32) -> (i32, i32) {
    %c0_i32 = arith.constant 0 : i32
    %c0_i32_0 = arith.constant 0 : i32
    %c0_i32_1 = arith.constant 0 : i32
    return %c0_i32, %c0_i32_0 : i32, i32
  }
  func.func @transform_6(%arg0: i32) -> (i32, i32) {
    %c0_i32 = arith.constant 0 : i32
    %c0_i32_0 = arith.constant 0 : i32
    %c0_i32_1 = arith.constant 0 : i32
    return %c0_i32, %c0_i32_0 : i32, i32
  }
  func.func @transform_7(%arg0: i32) -> (i32, i32) {
    %c0_i32 = arith.constant 0 : i32
    %c0_i32_0 = arith.constant 0 : i32
    %c0_i32_1 = arith.constant 0 : i32
    return %c0_i32, %c0_i32_0 : i32, i32
  }
  func.func @transform_8(%arg0: i32) -> (i32, i32) {
    %c0_i32 = arith.constant 0 : i32
    %c0_i32_0 = arith.constant 0 : i32
    %c0_i32_1 = arith.constant 0 : i32
    return %c0_i32, %c0_i32_0 : i32, i32
  }
  func.func @transform_9(%arg0: i32) -> (i32, i32) {
    %c0_i32 = arith.constant 0 : i32
    %c0_i32_0 = arith.constant 0 : i32
    return %arg0, %c0_i32 : i32, i32
  }
}

</mosaic_0001>

<bundles_post_ra>
// kernel: dqn_forward.2
= control target key start
LH: loop header
LB: loop body
LE: loop exit
PB: predicated region body
PF: predicated region fallthrough
CT: control target
= control target key end

     0   :  { %s939_s12 = smov 0   ;;  %s1057_s0 = inlined_call_operand.vmem [shape: bf16[256,256], index: 0, kind: input, shape index: {}]   ;;  %s1058_s1 = inlined_call_operand.vmem [shape: bf16[256,128], index: 1, kind: input, shape index: {}]   ;;  %s1059_s2 = inlined_call_operand.vmem [shape: f32[1,128], index: 2, kind: input, shape index: {}]   ;;  %s1060_s3 = inlined_call_operand.vmem [shape: bf16[256,128], index: 3, kind: output, shape index: {}]  }
   0x1 LB: > { %s658_s13 = sadd.s32 4294967295, %s917_s12   ;;  %p662_p0 = scmp.ge.s32.totalorder %s917_s12, 1  ;;  %s917_s12 = sphi %s939_s12, %s13_s12  }
   0x2   : > { %p139_p1 = scmp.lt.s32.totalorder %s917_s12, 3 }
   0x4   : > { %p140_p2 = pnand %p662_p0, %p139_p1 }
   0x5   : > { %v871_v0 = vld [vmem:[%s1058_s1 + $0x40] sm:$0xff] (!%p140_p2)   ;;  %s663_s16 = sshll.u32 (!%p140_p2), %s658_s13, 4  ;;  %v873_v2 = vld [vmem:[%s1058_s1 + $0x48] sm:$0xff] (!%p140_p2)   ;;  %v875_v4 = vld [vmem:[%s1058_s1 + $0x50] sm:$0xff] (!%p140_p2)  }
   0x6   : > { %143 = sbr.rel (%p140_p2) target bundleno = 287 (0x11f), region = 32  ;;  %v872_v1 = vld [vmem:[%s1058_s1] sm:$0xff] (!%p140_p2)   ;;  %783 = vmatprep.subr.bf16.mxu0 (!%p140_p2), %v871_v0  ;;  %847 = vmatprep.subr.bf16.mxu1 (!%p140_p2), %v871_v0  ;;  %v874_v3 = vld [vmem:[%s1058_s1 + $0x8] sm:$0xff] (!%p140_p2)   ;;  %p165_p3 = scmp.lt.s32.totalorder (!%p140_p2), %s663_s16, 31  ;;  %v876_v5 = vld [vmem:[%s1058_s1 + $0x10] sm:$0xff] (!%p140_p2)  }
   0x7   : > { %784 = vmatpush3.bf16.msra.mxu0 (!%p140_p2), %v872_v1  ;;  %855 = vmatpush3.bf16.msra.mxu1 (!%p140_p2), %v872_v1  ;;  %v877_v6 = vld [vmem:[%s1058_s1 + $0x58] sm:$0xff] (!%p140_p2)   ;;  %v879_v8 = vld [vmem:[%s1058_s1 + $0x60] sm:$0xff] (!%p140_p2)   ;;  %v881_v10 = vld [vmem:[%s1058_s1 + $0x68] sm:$0xff] (!%p140_p2)  }
   0x8   : > { %785 = vmatprep.subr.bf16.mxu0 (!%p140_p2), %v873_v2  ;;  %848 = vmatprep.subr.bf16.mxu1 (!%p140_p2), %v873_v2  ;;  %v878_v7 = vld [vmem:[%s1058_s1 + $0x18] sm:$0xff] (!%p140_p2)   ;;  %v880_v9 = vld [vmem:[%s1058_s1 + $0x20] sm:$0xff] (!%p140_p2)   ;;  %v882_v13 = vld [vmem:[%s1058_s1 + $0x28] sm:$0xff] (!%p140_p2)  }
   0x9   : > { %v883_v14 = vld [vmem:[%s1058_s1 + $0x70] sm:$0xff] (!%p140_p2)   ;;  %v885_v16 = vld [vmem:[%s1058_s1 + $0x78] sm:$0xff] (!%p140_p2)   ;;  %v1022_v34 = vld [vmem:[%s1059_s2] ss:$0 sm:$0xff] (!%p140_p2) }
   0xa   : > { %v884_v15 = vld [vmem:[%s1058_s1 + $0x30] sm:$0xff] (!%p140_p2)   ;;  %v886_v17 = vld [vmem:[%s1058_s1 + $0x38] sm:$0xff] (!%p140_p2)  }
   0xb   : > { %786 = vmatpush3.bf16.msra.mxu0 (!%p140_p2), %v874_v3  ;;  %856 = vmatpush3.bf16.msra.mxu1 (!%p140_p2), %v874_v3 }
   0xc   : > { %787 = vmatprep.subr.bf16.mxu0 (!%p140_p2), %v875_v4  ;;  %849 = vmatprep.subr.bf16.mxu1 (!%p140_p2), %v875_v4 }
   0xd   : > { %s1062_s16 = smov (!%p165_p3, %s663_s16), 31 }
   0xe   : > { %s719_s4 = sshll.u32 %s1062_s16, 3  ;;  %s667_s28 = sshll.u32 %s1062_s16, 2 }
   0xf   : > { %788 = vmatpush3.bf16.msra.mxu0 %v876_v5  ;;  %857 = vmatpush3.bf16.msra.mxu1 %v876_v5  ;;  %s980_s9 = scalar_lea.vmem %s1057_s0, %s719_s4  ;;  %s1032_s4 = scalar_lea.vmem %s1060_s3, %s667_s28 }
  0x10   : > { %789 = vmatprep.subr.bf16.mxu0 %v877_v6  ;;  %850 = vmatprep.subr.bf16.mxu1 %v877_v6  ;;  %v889_v11 = vld [vmem:[%s980_s9 + $0x4] ss:$8 sps:$4 sm:$0xff]   ;;  %v887_v18 = vld [vmem:[%s980_s9] ss:$8 sps:$4 sm:$0xff]   ;;  %v893_v20 = vld [vmem:[%s980_s9 + $0x14] ss:$8 sps:$4 sm:$0xff]  }
  0x11   : > { %v892_v12 = vld [vmem:[%s980_s9 + $0x44] ss:$8 sps:$4 sm:$0xff]   ;;  %441 = vmatprep.mubr.bf16.mxu0 %v889_v11  ;;  %v890_v19 = vld [vmem:[%s980_s9 + $0x40] ss:$8 sps:$4 sm:$0xff]   ;;  %v895_v21 = vld [vmem:[%s980_s9 + $0x54] ss:$8 sps:$4 sm:$0xff]  }
  0x12   : > { %473 = vmatprep.mubr.bf16.mxu1 %v892_v12  ;;  %v897_v22 = vld [vmem:[%s980_s9 + $0x10] ss:$8 sps:$4 sm:$0xff]   ;;  %v899_v24 = vld [vmem:[%s980_s9 + $0x24] ss:$8 sps:$4 sm:$0xff]   ;;  %v903_v26 = vld [vmem:[%s980_s9 + $0x20] ss:$8 sps:$4 sm:$0xff]  }
  0x13   : > { %790 = vmatpush3.bf16.msra.mxu0 %v878_v7  ;;  %858 = vmatpush3.bf16.msra.mxu1 %v878_v7  ;;  %v898_v23 = vld [vmem:[%s980_s9 + $0x50] ss:$8 sps:$4 sm:$0xff]   ;;  %v901_v25 = vld [vmem:[%s980_s9 + $0x64] ss:$8 sps:$4 sm:$0xff]   ;;  %v904_v27 = vld [vmem:[%s980_s9 + $0x60] ss:$8 sps:$4 sm:$0xff]  }
  0x14   : > { %791 = vmatprep.subr.bf16.mxu0 %v879_v8  ;;  %851 = vmatprep.subr.bf16.mxu1 %v879_v8  ;;  %v905_v28 = vld [vmem:[%s980_s9 + $0x34] ss:$8 sps:$4 sm:$0xff]   ;;  %v909_v30 = vld [vmem:[%s980_s9 + $0x30] ss:$8 sps:$4 sm:$0xff]  }
  0x15   : > { %v907_v29 = vld [vmem:[%s980_s9 + $0x74] ss:$8 sps:$4 sm:$0xff]   ;;  %v910_v31 = vld [vmem:[%s980_s9 + $0x70] ss:$8 sps:$4 sm:$0xff]  }
  0x17   : > { %792 = vmatpush3.bf16.msra.mxu0 %v880_v9  ;;  %859 = vmatpush3.bf16.msra.mxu1 %v880_v9 }
  0x18   : > { %793 = vmatprep.subr.bf16.mxu0 %v881_v10  ;;  %852 = vmatprep.subr.bf16.mxu1 %v881_v10 }
  0x1b   : > { %794 = vmatpush3.bf16.msra.mxu0 %v882_v13  ;;  %860 = vmatpush3.bf16.msra.mxu1 %v882_v13 }
  0x1c   : > { %795 = vmatprep.subr.bf16.mxu0 %v883_v14  ;;  %853 = vmatprep.subr.bf16.mxu1 %v883_v14 }
  0x1f   : > { %796 = vmatpush3.bf16.msra.mxu0 %v884_v15  ;;  %861 = vmatpush3.bf16.msra.mxu1 %v884_v15 }
  0x20   : > { %797 = vmatprep.subr.bf16.mxu0 %v885_v16  ;;  %854 = vmatprep.subr.bf16.mxu1 %v885_v16 }
  0x23   : > { %798 = vmatpush3.bf16.msra.mxu0 %v886_v17  ;;  %862 = vmatpush3.bf16.msra.mxu1 %v886_v17 }
  0x26   : > { %442 = vmatmul.mubr.bf16.vlgmr.msra.gmra.mrb[0].mxu0 %v887_v18  ;;  %474 = vmatmul.mubr.bf16.vlgmr.msra.gmra.mrb[0].mxu1 %v890_v19 }
  0x27   : > { %449 = vmatprep.mubr.bf16.mxu0 %v893_v20  ;;  %481 = vmatprep.mubr.bf16.mxu1 %v895_v21 }
  0x2e   : > { %450 = vmatmul.mubr.bf16.gmra.mrb[4].mxu0 %v897_v22  ;;  %482 = vmatmul.mubr.bf16.gmra.mrb[4].mxu1 %v898_v23 }
  0x2f   : > { %457 = vmatprep.mubr.bf16.mxu0 %v899_v24  ;;  %489 = vmatprep.mubr.bf16.mxu1 %v901_v25 }
  0x36   : > { %458 = vmatmul.mubr.bf16.gmra.mrb[8].mxu0 %v903_v26  ;;  %490 = vmatmul.mubr.bf16.gmra.mrb[8].mxu1 %v904_v27 }
  0x37   : > { %465 = vmatprep.mubr.bf16.mxu0 %v905_v28  ;;  %497 = vmatprep.mubr.bf16.mxu1 %v907_v29 }
  0x3e   : > { %466 = vmatmul.mubr.bf16.gmra.mrb[12].mxu0 %v909_v30  ;;  %498 = vmatmul.mubr.bf16.gmra.mrb[12].mxu1 %v910_v31 }
  0xf9   : > { %v799_v32 = vpop.f32.mrb[0].mxu0  ;;  %v823_v33 = vpop.f32.mrb[0].mxu1 }
  0xfa   : > { %v800_v35 = vpop.f32.mrb[1].mxu0  ;;  %v824_v36 = vpop.f32.mrb[1].mxu1 }
  0xfb   : > { %v801_v37 = vadd.f32 %v800_v35, %v799_v32  ;;  %v825_v38 = vadd.f32 %v824_v36, %v823_v33  ;;  %v802_v39 = vpop.f32.mrb[2].mxu0  ;;  %v826_v40 = vpop.f32.mrb[2].mxu1 }
  0xfc   : > { %v803_v41 = vpop.f32.mrb[3].mxu0  ;;  %v827_v42 = vpop.f32.mrb[3].mxu1 }
  0xfd   : > { %v444_v43 = vadd.f32 %v801_v37, %v1022_v34  ;;  %v476_v44 = vadd.f32 %v825_v38, %v1022_v34  ;;  %v804_v45 = vadd.f32 %v803_v41, %v802_v39  ;;  %v828_v46 = vadd.f32 %v827_v42, %v826_v40 }
  0xff   : > { %v447_v47 = vadd.f32 %v804_v45, %v1022_v34  ;;  %v479_v48 = vadd.f32 %v828_v46, %v1022_v34  ;;  %v506_v49 = vmax.f32 %v444_v43, 0.0  ;;  %v514_v50 = vmax.f32 %v476_v44, 0.0 }
 0x101   : > { %v507_v51 = vmax.f32 %v447_v47, 0.0  ;;  %v515_v52 = vmax.f32 %v479_v48, 0.0  ;;  %v805_v53 = vpop.f32.mrb[4].mxu0  ;;  %v829_v54 = vpop.f32.mrb[4].mxu1 }
 0x102   : > { %v806_v55 = vpop.f32.mrb[5].mxu0  ;;  %v830_v56 = vpop.f32.mrb[5].mxu1 }
 0x103   : > { %v739_v57 = vpack.c.bf16 %v507_v51, %v506_v49  ;;  %v759_v58 = vpack.c.bf16 %v515_v52, %v514_v50  ;;  %v807_v59 = vadd.f32 %v806_v55, %v805_v53  ;;  %v831_v60 = vadd.f32 %v830_v56, %v829_v54  ;;  %v808_v61 = vpop.f32.mrb[6].mxu0  ;;  %v832_v62 = vpop.f32.mrb[6].mxu1 }
 0x104   : > { %v809_v63 = vpop.f32.mrb[7].mxu0  ;;  %v833_v0 = vpop.f32.mrb[7].mxu1 }
 0x105   : > { %740 = vst [vmem:[%s1032_s4] sm:$0xff] %v739_v57   ;;  %779 = vst [vmem:[%s1032_s4 + $0x20] sm:$0xff] %v759_v58   ;;  %v452_v1 = vadd.f32 %v807_v59, %v1022_v34  ;;  %v484_v2 = vadd.f32 %v831_v60, %v1022_v34  ;;  %v810_v3 = vadd.f32 %v809_v63, %v808_v61 }
 0x106   : > { %v834_v4 = vadd.f32 %v833_v0, %v832_v62 }
 0x107   : > { %v455_v5 = vadd.f32 %v810_v3, %v1022_v34  ;;  %v508_v7 = vmax.f32 %v452_v1, 0.0  ;;  %v516_v8 = vmax.f32 %v484_v2, 0.0 }
 0x108   : > { %v487_v6 = vadd.f32 %v834_v4, %v1022_v34 }
 0x109   : > { %v509_v9 = vmax.f32 %v455_v5, 0.0  ;;  %v811_v11 = vpop.f32.mrb[8].mxu0  ;;  %v835_v12 = vpop.f32.mrb[8].mxu1 }
 0x10a   : > { %v517_v10 = vmax.f32 %v487_v6, 0.0  ;;  %v812_v13 = vpop.f32.mrb[9].mxu0  ;;  %v836_v14 = vpop.f32.mrb[9].mxu1 }
 0x10b   : > { %v744_v15 = vpack.c.bf16 %v509_v9, %v508_v7  ;;  %v813_v17 = vadd.f32 %v812_v13, %v811_v11  ;;  %v837_v18 = vadd.f32 %v836_v14, %v835_v12  ;;  %v814_v19 = vpop.f32.mrb[10].mxu0  ;;  %v838_v20 = vpop.f32.mrb[10].mxu1 }
 0x10c   : > { %v764_v16 = vpack.c.bf16 %v517_v10, %v516_v8  ;;  %v815_v21 = vpop.f32.mrb[11].mxu0  ;;  %v839_v22 = vpop.f32.mrb[11].mxu1 }
 0x10d   : > { %776 = vst [vmem:[%s1032_s4 + $0x8] sm:$0xff] %v744_v15   ;;  %v460_v23 = vadd.f32 %v813_v17, %v1022_v34  ;;  %v492_v24 = vadd.f32 %v837_v18, %v1022_v34  ;;  %v816_v25 = vadd.f32 %v815_v21, %v814_v19  ;;  %v840_v26 = vadd.f32 %v839_v22, %v838_v20 }
 0x10e   : > { %780 = vst [vmem:[%s1032_s4 + $0x28] sm:$0xff] %v764_v16  }
 0x10f   : > { %v463_v27 = vadd.f32 %v816_v25, %v1022_v34  ;;  %v495_v28 = vadd.f32 %v840_v26, %v1022_v34  ;;  %v510_v29 = vmax.f32 %v460_v23, 0.0  ;;  %v518_v30 = vmax.f32 %v492_v24, 0.0 }
 0x111   : > { %v511_v31 = vmax.f32 %v463_v27, 0.0  ;;  %v519_v32 = vmax.f32 %v495_v28, 0.0  ;;  %v817_v33 = vpop.f32.mrb[12].mxu0  ;;  %v841_v35 = vpop.f32.mrb[12].mxu1 }
 0x112   : > { %v818_v36 = vpop.f32.mrb[13].mxu0  ;;  %v842_v37 = vpop.f32.mrb[13].mxu1 }
 0x113   : > { %v749_v38 = vpack.c.bf16 %v511_v31, %v510_v29  ;;  %v769_v39 = vpack.c.bf16 %v519_v32, %v518_v30  ;;  %v819_v40 = vadd.f32 %v818_v36, %v817_v33  ;;  %v843_v41 = vadd.f32 %v842_v37, %v841_v35  ;;  %v820_v42 = vpop.f32.mrb[14].mxu0  ;;  %v844_v43 = vpop.f32.mrb[14].mxu1 }
 0x114   : > { %v821_v44 = vpop.f32.mrb[15].mxu0  ;;  %v845_v45 = vpop.f32.mrb[15].mxu1 }
 0x115   : > { %777 = vst [vmem:[%s1032_s4 + $0x10] sm:$0xff] %v749_v38   ;;  %781 = vst [vmem:[%s1032_s4 + $0x30] sm:$0xff] %v769_v39   ;;  %v468_v46 = vadd.f32 %v819_v40, %v1022_v34  ;;  %v500_v47 = vadd.f32 %v843_v41, %v1022_v34  ;;  %v822_v48 = vadd.f32 %v821_v44, %v820_v42 }
 0x116   : > { %v846_v49 = vadd.f32 %v845_v45, %v844_v43 }
 0x117   : > { %v471_v50 = vadd.f32 %v822_v48, %v1022_v34  ;;  %v512_v52 = vmax.f32 %v468_v46, 0.0  ;;  %v520_v53 = vmax.f32 %v500_v47, 0.0 }
 0x118   : > { %v503_v51 = vadd.f32 %v846_v49, %v1022_v34 }
 0x119   : > { %v513_v54 = vmax.f32 %v471_v50, 0.0 }
 0x11a   : > { %v521_v55 = vmax.f32 %v503_v51, 0.0 }
 0x11b   : > { %v754_v56 = vpack.c.bf16 %v513_v54, %v512_v52 }
 0x11c   : > { %v774_v57 = vpack.c.bf16 %v521_v55, %v520_v53 }
 0x11d   : > { %778 = vst [vmem:[%s1032_s4 + $0x18] sm:$0xff] %v754_v56  }
 0x11e   : > { %782 = vst [vmem:[%s1032_s4 + $0x38] sm:$0xff] %v774_v57  }
 0x11f PF: > { %s13_s12 = sadd.s32 1, %s917_s12  }
 0x120   : > { %p10_p4 = scmp.ge.s32.totalorder %s13_s12, 4  }
 0x122   :  { %12 = sbr.rel (!%p10_p4) target bundleno = 1 (0x1), region = 62 }

// kernel: dqn_forward.3
= control target key start
LH: loop header
LB: loop body
LE: loop exit
PB: predicated region body
PF: predicated region fallthrough
CT: control target
= control target key end

     0   :  { %v2492_v34 = vmov 0.0   ;;  %vm2493_vm0 = vmmov 0   ;;  %vm609_vm1 = vcmask 523264   ;;  %s3038_s1 = inlined_call_operand.vmem [shape: bf16[512,64], index: 1, kind: input, shape index: {}]   ;;  %s3039_s0 = inlined_call_operand.vmem [shape: bf16[1,72,512], index: 0, kind: input, shape index: {}]   ;;  %s3040_s3 = inlined_call_operand.vmem [shape: bf16[9,64,64], index: 3, kind: input, shape index: {}]   ;;  %s3041_s2 = inlined_call_operand.vmem [shape: f32[1,64], index: 2, kind: input, shape index: {}]   ;;  %s3042_s5 = inlined_call_operand.vmem [shape: bf16[64,512], index: 5, kind: input, shape index: {}]   ;;  %s3043_s7 = inlined_call_operand.vmem [shape: bf16[512,128], index: 7, kind: input, shape index: {}]   ;;  %s3044_s4 = inlined_call_operand.vmem [shape: f32[1,64], index: 4, kind: input, shape index: {}]   ;;  %s3045_s6 = inlined_call_operand.vmem [shape: f32[1,512], index: 6, kind: input, shape index: {}]   ;;  %s3046_s8 = inlined_call_operand.vmem [shape: f32[1,128], index: 8, kind: input, shape index: {}]   ;;  %s3047_s9 = inlined_call_operand.vmem [shape: f32[8,128], index: 9, kind: output, shape index: {}]  }
   0x1   :  { %v2340_v0 = vld [vmem:[%s3038_s1 + $0x40] sm:$0xff]   ;;  %v2344_v4 = vld [vmem:[%s3038_s1 + $0x48] sm:$0xff]   ;;  %v2348_v8 = vld [vmem:[%s3038_s1 + $0x50] sm:$0xff]  }
   0x2   :  { %v2341_v1 = vld [vmem:[%s3038_s1 + $0xc0] sm:$0xff]   ;;  %2048 = vmatprep.subr.bf16.mxu0 %v2340_v0  ;;  %v2345_v5 = vld [vmem:[%s3038_s1 + $0xc8] sm:$0xff]   ;;  %v2349_v9 = vld [vmem:[%s3038_s1 + $0xd0] sm:$0xff]  }
   0x3   :  { %v2342_v2 = vld [vmem:[%s3038_s1] sm:$0xff]   ;;  %2094 = vmatprep.subr.bf16.mxu1 %v2341_v1  ;;  %v2346_v6 = vld [vmem:[%s3038_s1 + $0x8] sm:$0xff]   ;;  %v2350_v10 = vld [vmem:[%s3038_s1 + $0x10] sm:$0xff]  }
   0x4   :  { %v2343_v3 = vld [vmem:[%s3038_s1 + $0x80] sm:$0xff]   ;;  %2049 = vmatpush3.bf16.msra.mxu0 %v2342_v2  ;;  %v2347_v7 = vld [vmem:[%s3038_s1 + $0x88] sm:$0xff]   ;;  %v2351_v11 = vld [vmem:[%s3038_s1 + $0x90] sm:$0xff]  }
   0x5   :  { %2095 = vmatpush3.bf16.msra.mxu1 %v2343_v3  ;;  %2050 = vmatprep.subr.bf16.mxu0 %v2344_v4  ;;  %v2352_v12 = vld [vmem:[%s3038_s1 + $0x58] sm:$0xff]   ;;  %v2356_v16 = vld [vmem:[%s3038_s1 + $0x60] sm:$0xff]   ;;  %v2360_v20 = vld [vmem:[%s3038_s1 + $0x68] sm:$0xff]  }
   0x6   :  { %2096 = vmatprep.subr.bf16.mxu1 %v2345_v5  ;;  %v2353_v13 = vld [vmem:[%s3038_s1 + $0xd8] sm:$0xff]   ;;  %v2357_v17 = vld [vmem:[%s3038_s1 + $0xe0] sm:$0xff]   ;;  %v2361_v21 = vld [vmem:[%s3038_s1 + $0xe8] sm:$0xff]  }
   0x7   :  { %v2354_v14 = vld [vmem:[%s3038_s1 + $0x18] sm:$0xff]   ;;  %v2358_v18 = vld [vmem:[%s3038_s1 + $0x20] sm:$0xff]   ;;  %v2362_v22 = vld [vmem:[%s3038_s1 + $0x28] sm:$0xff]  }
   0x8   :  { %2051 = vmatpush3.bf16.msra.mxu0 %v2346_v6  ;;  %v2355_v15 = vld [vmem:[%s3038_s1 + $0x98] sm:$0xff]   ;;  %v2359_v19 = vld [vmem:[%s3038_s1 + $0xa0] sm:$0xff]   ;;  %v2363_v23 = vld [vmem:[%s3038_s1 + $0xa8] sm:$0xff]  }
   0x9   :  { %2097 = vmatpush3.bf16.msra.mxu1 %v2347_v7  ;;  %2052 = vmatprep.subr.bf16.mxu0 %v2348_v8  ;;  %v2364_v24 = vld [vmem:[%s3038_s1 + $0x70] sm:$0xff]   ;;  %v2368_v28 = vld [vmem:[%s3038_s1 + $0x78] sm:$0xff]   ;;  %v2400_v43 = vld [vmem:[%s3040_s3 + $0x20] sm:$0xff]  }
   0xa   :  { %2098 = vmatprep.subr.bf16.mxu1 %v2349_v9  ;;  %v2365_v25 = vld [vmem:[%s3038_s1 + $0xf0] sm:$0xff]   ;;  %v2369_v29 = vld [vmem:[%s3038_s1 + $0xf8] sm:$0xff]   ;;  %v2401_v44 = vld [vmem:[%s3040_s3 + $0x28] sm:$0xff]  }
   0xb   :  { %v2366_v26 = vld [vmem:[%s3038_s1 + $0x30] sm:$0xff]   ;;  %v2370_v30 = vld [vmem:[%s3038_s1 + $0x38] sm:$0xff]   ;;  %v2402_v46 = vld [vmem:[%s3040_s3] sm:$0xff]  }
   0xc   :  { %2053 = vmatpush3.bf16.msra.mxu0 %v2350_v10  ;;  %v2367_v27 = vld [vmem:[%s3038_s1 + $0xb0] sm:$0xff]   ;;  %v2371_v31 = vld [vmem:[%s3038_s1 + $0xb8] sm:$0xff]   ;;  %v49_v51 = vld [vmem:[%s3039_s0 + $0x80] sm:$0xff] }
   0xd   :  { %2099 = vmatpush3.bf16.msra.mxu1 %v2351_v11  ;;  %2054 = vmatprep.subr.bf16.mxu0 %v2352_v12  ;;  %v2372_v32 = vld [vmem:[%s3039_s0] ss:$16 sps:$4 sm:$0xff]   ;;  %v2374_v33 = vld [vmem:[%s3039_s0 + $0x4] ss:$16 sps:$4 sm:$0xff]   ;;  %v2375_v35 = vld [vmem:[%s3039_s0 + $0x8] ss:$16 sps:$4 sm:$0xff]   ;;  %v1852_v55 = vcombine.high %v49_v51, %v49_v51  ;;  %v1851_v57 = vcombine.low %v49_v51, %v49_v51 }
   0xe   :  { %2100 = vmatprep.subr.bf16.mxu1 %v2353_v13  ;;  %v2377_v36 = vld [vmem:[%s3039_s0 + $0xc] ss:$16 sps:$4 sm:$0xff]   ;;  %440 = vmatprep.mubr.bf16.mxu0 %v2374_v33  ;;  %v2378_v37 = vld [vmem:[%s3039_s0 + $0x24] ss:$16 sps:$4 sm:$0xff]   ;;  %v2380_v39 = vld [vmem:[%s3039_s0 + $0x20] ss:$16 sps:$4 sm:$0xff]  }
   0xf   :  { %512 = vmatprep.mubr.bf16.mxu1 %v2377_v36  ;;  %v2381_v38 = vld [vmem:[%s3039_s0 + $0x2c] ss:$16 sps:$4 sm:$0xff]   ;;  %v2383_v40 = vld [vmem:[%s3039_s0 + $0x28] ss:$16 sps:$4 sm:$0xff]   ;;  %v2384_v41 = vld [vmem:[%s3039_s0 + $0x44] ss:$16 sps:$4 sm:$0xff]  }
  0x10   :  { %2055 = vmatpush3.bf16.msra.mxu0 %v2354_v14  ;;  %v2387_v42 = vld [vmem:[%s3039_s0 + $0x4c] ss:$16 sps:$4 sm:$0xff]   ;;  %v2386_v45 = vld [vmem:[%s3039_s0 + $0x40] ss:$16 sps:$4 sm:$0xff]   ;;  %v2389_v47 = vld [vmem:[%s3039_s0 + $0x48] ss:$16 sps:$4 sm:$0xff]  }
  0x11   :  { %2101 = vmatpush3.bf16.msra.mxu1 %v2355_v15  ;;  %2056 = vmatprep.subr.bf16.mxu0 %v2356_v16  ;;  %v2390_v48 = vld [vmem:[%s3039_s0 + $0x64] ss:$16 sps:$4 sm:$0xff]   ;;  %v2393_v49 = vld [vmem:[%s3039_s0 + $0x6c] ss:$16 sps:$4 sm:$0xff]   ;;  %v2392_v53 = vld [vmem:[%s3039_s0 + $0x60] ss:$16 sps:$4 sm:$0xff]  }
  0x12   :  { %2102 = vmatprep.subr.bf16.mxu1 %v2357_v17  ;;  %v2403_v50 = vld [vmem:[%s3040_s3 + $0x30] sm:$0xff]   ;;  %v50_v52 = vld [vmem:[%s3039_s0 + $0x88] sm:$0xff]  ;;  %v2407_v61 = vld [vmem:[%s3040_s3 + $0x18] sm:$0xff]  }
  0x13   :  { %v2395_v54 = vld [vmem:[%s3039_s0 + $0x68] ss:$16 sps:$4 sm:$0xff]   ;;  %v1854_v56 = vcombine.high %v50_v52, %v50_v52  ;;  %v1853_v58 = vcombine.low %v50_v52, %v50_v52  ;;  %v2406_v60 = vld [vmem:[%s3040_s3 + $0x10] sm:$0xff]   ;;  %v2736_v1 = vld [vmem:[%s3041_s2] ss:$0 sm:$0xff] }
  0x14   :  { %2057 = vmatpush3.bf16.msra.mxu0 %v2358_v18  ;;  %v2404_v59 = vld [vmem:[%s3040_s3 + $0x8] sm:$0xff]   ;;  %v2405_v62 = vld [vmem:[%s3040_s3 + $0x38] sm:$0xff]  }
  0x15   :  { %2103 = vmatpush3.bf16.msra.mxu1 %v2359_v19  ;;  %2058 = vmatprep.subr.bf16.mxu0 %v2360_v20 }
  0x16   :  { %2104 = vmatprep.subr.bf16.mxu1 %v2361_v21 }
  0x18   :  { %2059 = vmatpush3.bf16.msra.mxu0 %v2362_v22 }
  0x19   :  { %2105 = vmatpush3.bf16.msra.mxu1 %v2363_v23  ;;  %2060 = vmatprep.subr.bf16.mxu0 %v2364_v24  ;;  %v2408_v24 = vld [vmem:[%s3040_s3 + $0x60] sm:$0xff]  }
  0x1a   :  { %2106 = vmatprep.subr.bf16.mxu1 %v2365_v25 }
  0x1c   :  { %2061 = vmatpush3.bf16.msra.mxu0 %v2366_v26 }
  0x1d   :  { %2107 = vmatpush3.bf16.msra.mxu1 %v2367_v27  ;;  %2062 = vmatprep.subr.bf16.mxu0 %v2368_v28 }
  0x1e   :  { %2108 = vmatprep.subr.bf16.mxu1 %v2369_v29 }
  0x20   :  { %2063 = vmatpush3.bf16.msra.mxu0 %v2370_v30 }
  0x21   :  { %2109 = vmatpush3.bf16.msra.mxu1 %v2371_v31  ;;  %2229 = vmatprep.subr.bf16.mxu0 %v2492_v34 }
  0x22   :  { %2241 = vmatprep.subr.bf16.mxu1 %v2492_v34 }
  0x23   :  { %441 = vmatmul.mubr.bf16.vlgmr.msra.gmra.mrb[0].mxu0 %v2372_v32  ;;  %v2409_v32 = vld [vmem:[%s3040_s3 + $0x40] sm:$0xff]  }
  0x24   :  { %513 = vmatmul.mubr.bf16.vlgmr.msra.gmra.mrb[0].mxu1 %v2375_v35  ;;  %448 = vmatprep.mubr.bf16.mxu0 %v2378_v37 }
  0x25   :  { %520 = vmatprep.mubr.bf16.mxu1 %v2381_v38  ;;  %2230 = vmatpush3.bf16.msra.mxu0 %v2400_v43  ;;  %v2410_v38 = vld [vmem:[%s3040_s3 + $0x68] sm:$0xff]  }
  0x26   :  { %2231 = vmatprep.subr.bf16.mxu0 %v2492_v34  ;;  %2242 = vmatpush3.bf16.msra.mxu1 %v2402_v46 }
  0x27   :  { %2243 = vmatprep.subr.bf16.mxu1 %v2492_v34 }
  0x29   :  { %2232 = vmatpush3.bf16.msra.mxu0 %v2401_v44 }
  0x2a   :  { %2233 = vmatprep.subr.bf16.mxu0 %v2492_v34  ;;  %2244 = vmatpush3.bf16.msra.mxu1 %v2404_v59 }
  0x2b   :  { %449 = vmatmul.mubr.bf16.gmra.mrb[4].mxu0 %v2380_v39  ;;  %2245 = vmatprep.subr.bf16.mxu1 %v2492_v34 }
  0x2c   :  { %521 = vmatmul.mubr.bf16.gmra.mrb[4].mxu1 %v2383_v40  ;;  %456 = vmatprep.mubr.bf16.mxu0 %v2384_v41 }
  0x2d   :  { %528 = vmatprep.mubr.bf16.mxu1 %v2387_v42  ;;  %2234 = vmatpush3.bf16.msra.mxu0 %v2403_v50  ;;  %v2411_v42 = vld [vmem:[%s3040_s3 + $0x48] sm:$0xff]  }
  0x2e   :  { %2235 = vmatprep.subr.bf16.mxu0 %v2492_v34  ;;  %2246 = vmatpush3.bf16.msra.mxu1 %v2406_v60 }
  0x2f   :  { %2247 = vmatprep.subr.bf16.mxu1 %v2492_v34 }
  0x31   :  { %2236 = vmatpush3.bf16.msra.mxu0 %v2405_v62 }
  0x32   :  { %2248 = vmatpush3.bf16.msra.mxu1 %v2407_v61  ;;  %2253 = vmatprep.subr.bf16.mxu0 %v2492_v34  ;;  %v2414_v61 = vld [vmem:[%s3040_s3 + $0x78] sm:$0xff]  }
  0x33   :  { %457 = vmatmul.mubr.bf16.gmra.mrb[8].mxu0 %v2386_v45  ;;  %2265 = vmatprep.subr.bf16.mxu1 %v2492_v34 }
  0x34   :  { %529 = vmatmul.mubr.bf16.gmra.mrb[8].mxu1 %v2389_v47  ;;  %464 = vmatprep.mubr.bf16.mxu0 %v2390_v48 }
  0x35   :  { %536 = vmatprep.mubr.bf16.mxu1 %v2393_v49  ;;  %v2412_v49 = vld [vmem:[%s3040_s3 + $0x70] sm:$0xff]  }
  0x3b   :  { %465 = vmatmul.mubr.bf16.gmra.mrb[12].mxu0 %v2392_v53 }
  0x3c   :  { %537 = vmatmul.mubr.bf16.gmra.mrb[12].mxu1 %v2395_v54  ;;  %472 = vmatprep.mubr.bf16.mxu0 %v1852_v55 }
  0x3d   :  { %544 = vmatprep.mubr.bf16.mxu1 %v1854_v56 }
  0x43   :  { %473 = vmatmul.mubr.bf16.gmra.mrb[16].mxu0 %v1851_v57  ;;  %v2413_v57 = vld [vmem:[%s3040_s3 + $0x50] sm:$0xff]  }
  0x44   :  { %545 = vmatmul.mubr.bf16.gmra.mrb[16].mxu1 %v1853_v58  ;;  %2237 = vmatprep.mubr.msk.bf16.mxu0 %vm2493_vm0, %v2492_v34 }
  0x45   :  { %2249 = vmatprep.mubr.msk.bf16.mxu1 %vm2493_vm0, %v2492_v34 }
  0xf6   :  { %v2064_v63 = vpop.f32.mrb[0].mxu0 }
  0xf7   :  { %v2110_v0 = vpop.f32.mrb[0].mxu1  ;;  %v2065_v2 = vpop.f32.mrb[1].mxu0 }
  0xf8   :  { %v2066_v3 = vadd.f32 %v2065_v2, %v2064_v63  ;;  %v2111_v4 = vpop.f32.mrb[1].mxu1  ;;  %v2067_v5 = vpop.f32.mrb[2].mxu0  ;;  %v2415_v2 = vld [vmem:[%s3040_s3 + $0x58] sm:$0xff]  }
  0xf9   :  { %v2112_v6 = vadd.f32 %v2111_v4, %v2110_v0  ;;  %v2113_v7 = vpop.f32.mrb[2].mxu1  ;;  %v2068_v8 = vpop.f32.mrb[3].mxu0 }
  0xfa   :  { %v443_v9 = vadd.f32 %v2066_v3, %v2736_v1  ;;  %v2069_v10 = vadd.f32 %v2068_v8, %v2067_v5  ;;  %v2114_v11 = vpop.f32.mrb[3].mxu1 }
  0xfb   :  { %v2115_v12 = vadd.f32 %v2114_v11, %v2113_v7 }
  0xfc   :  { %v515_v13 = vadd.f32 %v2112_v6, %v443_v9  ;;  %v446_v14 = vadd.f32 %v2069_v10, %v2736_v1  ;;  %v2416_v10 = vld [vmem:[%s3040_s3 + $0xa0] sm:$0xff]  }
  0xfe   :  { %v518_v15 = vadd.f32 %v2115_v12, %v446_v14  ;;  %v2070_v16 = vpop.f32.mrb[4].mxu0  ;;  %v552_v19 = vmax.f32 %v515_v13, 0.0 }
  0xff   :  { %v2071_v17 = vpop.f32.mrb[5].mxu0  ;;  %v2116_v18 = vpop.f32.mrb[4].mxu1 }
 0x100   :  { %v553_v20 = vmax.f32 %v518_v15, 0.0  ;;  %v2072_v21 = vadd.f32 %v2071_v17, %v2070_v16  ;;  %v2073_v22 = vpop.f32.mrb[6].mxu0  ;;  %v2117_v23 = vpop.f32.mrb[5].mxu1 }
 0x101   :  { %v2074_v25 = vpop.f32.mrb[7].mxu0  ;;  %v2118_v26 = vadd.f32 %v2117_v23, %v2116_v18  ;;  %v2119_v27 = vpop.f32.mrb[6].mxu1  ;;  %v2417_v18 = vld [vmem:[%s3040_s3 + $0x80] sm:$0xff]  }
 0x102   :  { %v561_v28 = vpack.c.bf16 %v553_v20, %v552_v19  ;;  %v451_v29 = vadd.f32 %v2072_v21, %v2736_v1  ;;  %v2075_v30 = vadd.f32 %v2074_v25, %v2073_v22  ;;  %v2120_v31 = vpop.f32.mrb[7].mxu1  ;;  %v2418_v22 = vld [vmem:[%s3040_s3 + $0xa8] sm:$0xff]  }
 0x103   :  { %v2121_v33 = vadd.f32 %v2120_v31, %v2119_v27 }
 0x104   :  { %v584_v35 = vrot.slane %v561_v28, 4  ;;  %2250 = vmatmul.mubr.msk.bf16.vlgmr.msra.gmra.mrb[20].mxu1 %vm609_vm1, %v561_v28  ;;  %v454_v36 = vadd.f32 %v2075_v30, %v2736_v1  ;;  %v523_v37 = vadd.f32 %v2118_v26, %v451_v29  ;;  %v2419_v26 = vld [vmem:[%s3040_s3 + $0x88] sm:$0xff]  }
 0x105   :  { %2266 = vmatpush3.bf16.msra.mxu1 %v2408_v24  ;;  %2273 = vmatprep.mubr.msk.bf16.mxu1 %vm2493_vm0, %v2492_v34 }
 0x106   :  { %v554_v39 = vmax.f32 %v523_v37, 0.0  ;;  %2238 = vmatmul.mubr.msk.bf16.vlgmr.msra.gmra.mrb[20].mxu0 %vm609_vm1, %v584_v35  ;;  %2267 = vmatprep.subr.bf16.mxu1 %v2492_v34  ;;  %v526_v40 = vadd.f32 %v2121_v33, %v454_v36  ;;  %v2076_v41 = vpop.f32.mrb[8].mxu0  ;;  %v2420_v33 = vld [vmem:[%s3040_s3 + $0xb0] sm:$0xff]  }
 0x107   :  { %2254 = vmatpush3.bf16.msra.mxu0 %v2409_v32  ;;  %v2077_v43 = vpop.f32.mrb[9].mxu0  ;;  %2261 = vmatprep.mubr.msk.bf16.mxu0 %vm2493_vm0, %v2492_v34  ;;  %v2122_v44 = vpop.f32.mrb[8].mxu1 }
 0x108   :  { %v555_v45 = vmax.f32 %v526_v40, 0.0  ;;  %2255 = vmatprep.subr.bf16.mxu0 %v2492_v34  ;;  %v2078_v46 = vadd.f32 %v2077_v43, %v2076_v41  ;;  %v2079_v47 = vpop.f32.mrb[10].mxu0  ;;  %v2123_v48 = vpop.f32.mrb[9].mxu1  ;;  %v2421_v41 = vld [vmem:[%s3040_s3 + $0x90] sm:$0xff]   ;;  %v2422_v43 = vld [vmem:[%s3040_s3 + $0xb8] sm:$0xff]  }
 0x109   :  { %2268 = vmatpush3.bf16.msra.mxu1 %v2410_v38  ;;  %v2080_v50 = vpop.f32.mrb[11].mxu0  ;;  %v2124_v51 = vadd.f32 %v2123_v48, %v2122_v44  ;;  %v2125_v52 = vpop.f32.mrb[10].mxu1  ;;  %v2427_v48 = vld [vmem:[%s3040_s3 + $0xc8] sm:$0xff]  }
 0x10a   :  { %v562_v53 = vpack.c.bf16 %v555_v45, %v554_v39  ;;  %2269 = vmatprep.subr.bf16.mxu1 %v2492_v34  ;;  %v459_v54 = vadd.f32 %v2078_v46, %v2736_v1  ;;  %v2081_v55 = vadd.f32 %v2080_v50, %v2079_v47  ;;  %v2126_v56 = vpop.f32.mrb[11].mxu1  ;;  %v2424_v45 = vld [vmem:[%s3040_s3 + $0xe0] sm:$0xff]   ;;  %v2426_v47 = vld [vmem:[%s3040_s3 + $0xe8] sm:$0xff]   ;;  %v2429_v50 = vld [vmem:[%s3040_s3 + $0xd0] sm:$0xff]  }
 0x10b   :  { %2256 = vmatpush3.bf16.msra.mxu0 %v2411_v42  ;;  %v2127_v58 = vadd.f32 %v2126_v56, %v2125_v52  ;;  %v2425_v46 = vld [vmem:[%s3040_s3 + $0xc0] sm:$0xff]   ;;  %v2431_v52 = vld [vmem:[%s3040_s3 + $0xd8] sm:$0xff]   ;;  %v2434_v56 = vld [vmem:[%s3040_s3 + $0x110] sm:$0xff]  }
 0x10c   :  { %2257 = vmatprep.subr.bf16.mxu0 %v2492_v34  ;;  %v462_v59 = vadd.f32 %v2081_v55, %v2736_v1  ;;  %v531_v60 = vadd.f32 %v2124_v51, %v459_v54  ;;  %v807_v5 = vrot.slane %v562_v53, 4  ;;  %v2430_v51 = vld [vmem:[%s3040_s3 + $0xf8] sm:$0xff]   ;;  %v2432_v54 = vld [vmem:[%s3040_s3 + $0x100] sm:$0xff]   ;;  %v2433_v55 = vld [vmem:[%s3040_s3 + $0x108] sm:$0xff]  }
 0x10d   :  { %2270 = vmatpush3.bf16.msra.mxu1 %v2412_v49  ;;  %v2428_v49 = vld [vmem:[%s3040_s3 + $0xf0] sm:$0xff]  }
 0x10e   :  { %2271 = vmatprep.subr.bf16.mxu1 %v2492_v34  ;;  %v556_v62 = vmax.f32 %v531_v60, 0.0  ;;  %v534_v63 = vadd.f32 %v2127_v58, %v462_v59  ;;  %v2082_v0 = vpop.f32.mrb[12].mxu0  ;;  %v2435_v58 = vld [vmem:[%s3040_s3 + $0x118] sm:$0xff]   ;;  %v2436_v60 = vld [vmem:[%s3042_s5] ss:$16 sps:$4 sm:$0xff]  }
 0x10f   :  { %2258 = vmatpush3.bf16.msra.mxu0 %v2413_v57  ;;  %v2083_v3 = vpop.f32.mrb[13].mxu0  ;;  %v2128_v4 = vpop.f32.mrb[12].mxu1 }
 0x110   :  { %2259 = vmatprep.subr.bf16.mxu0 %v2492_v34  ;;  %v557_v6 = vmax.f32 %v534_v63, 0.0  ;;  %v2084_v7 = vadd.f32 %v2083_v3, %v2082_v0  ;;  %v2085_v8 = vpop.f32.mrb[14].mxu0  ;;  %v2129_v9 = vpop.f32.mrb[13].mxu1  ;;  %v2442_v63 = vld [vmem:[%s3042_s5 + $0x20] ss:$16 sps:$4 sm:$0xff]  }
 0x111   :  { %2272 = vmatpush3.bf16.msra.mxu1 %v2414_v61  ;;  %v2086_v11 = vpop.f32.mrb[15].mxu0  ;;  %v2130_v12 = vadd.f32 %v2129_v9, %v2128_v4  ;;  %v2131_v13 = vpop.f32.mrb[14].mxu1  ;;  %v2438_v61 = vld [vmem:[%s3042_s5 + $0x4] ss:$16 sps:$4 sm:$0xff]   ;;  %v2447_v3 = vld [vmem:[%s3042_s5 + $0x2c] ss:$16 sps:$4 sm:$0xff]  }
 0x112   :  { %2289 = vmatprep.subr.bf16.mxu1 %v2492_v34  ;;  %v563_v14 = vpack.c.bf16 %v557_v6, %v556_v62  ;;  %v467_v15 = vadd.f32 %v2084_v7, %v2736_v1  ;;  %v2087_v16 = vadd.f32 %v2086_v11, %v2085_v8  ;;  %v2132_v17 = vpop.f32.mrb[15].mxu1  ;;  %v2439_v62 = vld [vmem:[%s3042_s5 + $0x8] ss:$16 sps:$4 sm:$0xff]   ;;  %v2444_v0 = vld [vmem:[%s3042_s5 + $0x24] ss:$16 sps:$4 sm:$0xff]  }
 0x113   :  { %2260 = vmatpush3.bf16.msra.mxu0 %v2415_v2  ;;  %v2133_v19 = vadd.f32 %v2132_v17, %v2131_v13  ;;  %v2445_v2 = vld [vmem:[%s3042_s5 + $0x28] ss:$16 sps:$4 sm:$0xff]   ;;  %v2450_v4 = vld [vmem:[%s3042_s5 + $0x44] ss:$16 sps:$4 sm:$0xff]   ;;  %v2448_v6 = vld [vmem:[%s3042_s5 + $0x40] ss:$16 sps:$4 sm:$0xff]  }
 0x114   :  { %2274 = vmatmul.mubr.msk.bf16.vlgmr.msra.gmra.mrb[24].mxu1 %vm609_vm1, %v807_v5  ;;  %2277 = vmatprep.subr.bf16.mxu0 %v2492_v34  ;;  %v470_v20 = vadd.f32 %v2087_v16, %v2736_v1  ;;  %v539_v21 = vadd.f32 %v2130_v12, %v467_v15  ;;  %v963_v44 = vrot.slane %v563_v14, 4  ;;  %v2453_v5 = vld [vmem:[%s3042_s5 + $0x4c] ss:$16 sps:$4 sm:$0xff]   ;;  %v2451_v7 = vld [vmem:[%s3042_s5 + $0x48] ss:$16 sps:$4 sm:$0xff]   ;;  %v2494_v12 = vmov 0  }
 0x115   :  { %2290 = vmatpush3.bf16.msra.mxu1 %v2416_v10  ;;  %2297 = vmatprep.mubr.msk.bf16.mxu1 %vm2493_vm0, %v2492_v34  ;;  %v2456_v8 = vld [vmem:[%s3042_s5 + $0x64] ss:$16 sps:$4 sm:$0xff]   ;;  %v2459_v9 = vld [vmem:[%s3042_s5 + $0x6c] ss:$16 sps:$4 sm:$0xff]   ;;  %v2454_v10 = vld [vmem:[%s3042_s5 + $0x60] ss:$16 sps:$4 sm:$0xff]  }
 0x116   :  { %2262 = vmatmul.mubr.msk.bf16.vlgmr.msra.gmra.mrb[24].mxu0 %vm609_vm1, %v562_v53  ;;  %2291 = vmatprep.subr.bf16.mxu1 %v2492_v34  ;;  %v558_v23 = vmax.f32 %v539_v21, 0.0  ;;  %v542_v24 = vadd.f32 %v2133_v19, %v470_v20  ;;  %v2088_v25 = vpop.f32.mrb[16].mxu0  ;;  %v2457_v11 = vld [vmem:[%s3042_s5 + $0x68] ss:$16 sps:$4 sm:$0xff]   ;;  %v2460_v13 = vld [vmem:[%s3043_s7 + $0x40] sm:$0xff]  }
 0x117   :  { %2278 = vmatpush3.bf16.msra.mxu0 %v2417_v18  ;;  %2285 = vmatprep.mubr.msk.bf16.mxu0 %vm2493_vm0, %v2492_v34  ;;  %v2089_v27 = vpop.f32.mrb[17].mxu0  ;;  %v2134_v28 = vpop.f32.mrb[16].mxu1 }
 0x118   :  { %2279 = vmatprep.subr.bf16.mxu0 %v2492_v34  ;;  %v559_v29 = vmax.f32 %v542_v24, 0.0  ;;  %v2090_v30 = vadd.f32 %v2089_v27, %v2088_v25  ;;  %v2091_v31 = vpop.f32.mrb[18].mxu0  ;;  %v2135_v32 = vpop.f32.mrb[17].mxu1 }
 0x119   :  { %2292 = vmatpush3.bf16.msra.mxu1 %v2418_v22  ;;  %v2092_v35 = vpop.f32.mrb[19].mxu0  ;;  %v2136_v36 = vadd.f32 %v2135_v32, %v2134_v28  ;;  %v2137_v37 = vpop.f32.mrb[18].mxu1 }
 0x11a   :  { %2293 = vmatprep.subr.bf16.mxu1 %v2492_v34  ;;  %v564_v38 = vpack.c.bf16 %v559_v29, %v558_v23  ;;  %v475_v39 = vadd.f32 %v2090_v30, %v2736_v1  ;;  %v2138_v40 = vpop.f32.mrb[19].mxu1  ;;  %v2423_v1 = vld [vmem:[%s3040_s3 + $0x98] sm:$0xff]  }
 0x11b   :  { %2280 = vmatpush3.bf16.msra.mxu0 %v2419_v26 }
 0x11c   :  { %2281 = vmatprep.subr.bf16.mxu0 %v2492_v34  ;;  %v547_v42 = vadd.f32 %v2136_v36, %v475_v39  ;;  %v1119_v53 = vrot.slane %v564_v38, 4 }
 0x11d   :  { %2294 = vmatpush3.bf16.msra.mxu1 %v2420_v33 }
 0x11e   :  { %2295 = vmatprep.subr.bf16.mxu1 %v2492_v34  ;;  %v560_v57 = vmax.f32 %v547_v42, 0.0 }
 0x11f   :  { %2282 = vmatpush3.bf16.msra.mxu0 %v2421_v41 }
 0x120   :  { %2283 = vmatprep.subr.bf16.mxu0 %v2492_v34  ;;  %v565_v59 = vpack.c.bf16 %v560_v57, %v560_v57 }
 0x121   :  { %2296 = vmatpush3.bf16.msra.mxu1 %v2422_v43 }
 0x122   :  { %2313 = vmatprep.subr.bf16.mxu1 %v2492_v34 }
 0x123   :  { %2284 = vmatpush3.bf16.msra.mxu0 %v2423_v1 }
 0x124   :  { %2298 = vmatmul.mubr.msk.bf16.vlgmr.msra.gmra.mrb[28].mxu1 %vm609_vm1, %v963_v44  ;;  %2301 = vmatprep.subr.bf16.mxu0 %v2492_v34 }
 0x125   :  { %2314 = vmatpush3.bf16.msra.mxu1 %v2424_v45  ;;  %2321 = vmatprep.mubr.msk.bf16.mxu1 %vm2493_vm0, %v2492_v34 }
 0x126   :  { %2286 = vmatmul.mubr.msk.bf16.vlgmr.msra.gmra.mrb[28].mxu0 %vm609_vm1, %v563_v14  ;;  %2315 = vmatprep.subr.bf16.mxu1 %v2492_v34  ;;  %v2461_v14 = vld [vmem:[%s3043_s7 + $0xc0] sm:$0xff]  }
 0x127   :  { %2302 = vmatpush3.bf16.msra.mxu0 %v2425_v46  ;;  %2309 = vmatprep.mubr.msk.bf16.mxu0 %vm2493_vm0, %v2492_v34 }
 0x128   :  { %2303 = vmatprep.subr.bf16.mxu0 %v2492_v34 }
 0x129   :  { %2316 = vmatpush3.bf16.msra.mxu1 %v2426_v47 }
 0x12a   :  { %2317 = vmatprep.subr.bf16.mxu1 %v2492_v34 }
 0x12b   :  { %2304 = vmatpush3.bf16.msra.mxu0 %v2427_v48 }
 0x12c   :  { %2305 = vmatprep.subr.bf16.mxu0 %v2492_v34 }
 0x12d   :  { %2318 = vmatpush3.bf16.msra.mxu1 %v2428_v49 }
 0x12e   :  { %2319 = vmatprep.subr.bf16.mxu1 %v2492_v34 }
 0x12f   :  { %2306 = vmatpush3.bf16.msra.mxu0 %v2429_v50 }
 0x130   :  { %2307 = vmatprep.subr.bf16.mxu0 %v2492_v34 }
 0x131   :  { %2320 = vmatpush3.bf16.msra.mxu1 %v2430_v51 }
 0x132   :  { %1396 = vmatprep.subr.bf16.mxu1 %v2438_v61 }
 0x133   :  { %2308 = vmatpush3.bf16.msra.mxu0 %v2431_v52 }
 0x134   :  { %2322 = vmatmul.mubr.msk.bf16.vlgmr.msra.gmra.mrb[32].mxu1 %vm609_vm1, %v1119_v53  ;;  %2325 = vmatprep.subr.bf16.mxu0 %v2492_v34 }
 0x135   :  { %1397 = vmatpush1.bf16.msra.mxu1 %v2436_v60  ;;  %1428 = vmatprep.mubr.bf16.mxu1 %v2494_v12 }
 0x136   :  { %2310 = vmatmul.mubr.msk.bf16.vlgmr.msra.gmra.mrb[32].mxu0 %vm609_vm1, %v564_v38  ;;  %1398 = vmatprep.subr.bf16.mxu1 %v2444_v0  ;;  %v2464_v0 = vld [vmem:[%s3043_s7 + $0x48] sm:$0xff]  }
 0x137   :  { %2326 = vmatpush3.bf16.msra.mxu0 %v2432_v54  ;;  %2333 = vmatprep.mubr.msk.bf16.mxu0 %vm2493_vm0, %v2492_v34 }
 0x138   :  { %2327 = vmatprep.subr.bf16.mxu0 %v2492_v34 }
 0x139   :  { %1399 = vmatpush1.bf16.msra.mxu1 %v2442_v63 }
 0x13a   :  { %1400 = vmatprep.subr.bf16.mxu1 %v2450_v4  ;;  %v2467_v4 = vld [vmem:[%s3043_s7 + $0x88] sm:$0xff]  }
 0x13b   :  { %2328 = vmatpush3.bf16.msra.mxu0 %v2433_v55  ;;  %v1996_v55 = vld [vmem:[%s3044_s4] ss:$0 sm:$0xff] }
 0x13c   :  { %2329 = vmatprep.subr.bf16.mxu0 %v2492_v34 }
 0x13d   :  { %1401 = vmatpush1.bf16.msra.mxu1 %v2448_v6  ;;  %v2469_v6 = vld [vmem:[%s3043_s7 + $0xd0] sm:$0xff]  }
 0x13e   :  { %1402 = vmatprep.subr.bf16.mxu1 %v2456_v8  ;;  %v2471_v8 = vld [vmem:[%s3043_s7 + $0x90] sm:$0xff]  }
 0x13f   :  { %2330 = vmatpush3.bf16.msra.mxu0 %v2434_v56 }
 0x140   :  { %2331 = vmatprep.subr.bf16.mxu0 %v2492_v34  ;;  %v2441_v34 = vld [vmem:[%s3042_s5 + $0xc] ss:$16 sps:$4 sm:$0xff]  }
 0x141   :  { %1403 = vmatpush1.bf16.msra.mxu1 %v2454_v10  ;;  %v2473_v10 = vld [vmem:[%s3043_s7 + $0xd8] sm:$0xff]  }
 0x142   :  { %2185 = vmatprep.subr.bf16.mxu1 %v2460_v13  ;;  %v2476_v13 = vld [vmem:[%s3043_s7 + $0x60] sm:$0xff]  }
 0x143   :  { %2332 = vmatpush3.bf16.msra.mxu0 %v2435_v58 }
 0x144   :  { %1437 = vmatprep.subr.bf16.mxu0 %v2441_v34  ;;  %v2463_v34 = vld [vmem:[%s3043_s7 + $0x80] sm:$0xff]  }
 0x146   :  { %2334 = vmatmul.mubr.msk.bf16.vlgmr.msra.gmra.mrb[36].mxu0 %vm609_vm1, %v565_v59 }
 0x147   :  { %1438 = vmatpush1.bf16.msra.mxu0 %v2439_v62  ;;  %1469 = vmatprep.mubr.bf16.mxu0 %v2494_v12  ;;  %v2462_v62 = vld [vmem:[%s3043_s7] sm:$0xff]   ;;  %v2475_v12 = vld [vmem:[%s3043_s7 + $0x98] sm:$0xff]  }
 0x148   :  { %1439 = vmatprep.subr.bf16.mxu0 %v2447_v3  ;;  %v2466_v3 = vld [vmem:[%s3043_s7 + $0x8] sm:$0xff]  }
 0x14b   :  { %1440 = vmatpush1.bf16.msra.mxu0 %v2445_v2  ;;  %v2465_v2 = vld [vmem:[%s3043_s7 + $0xc8] sm:$0xff]  }
 0x14c   :  { %1441 = vmatprep.subr.bf16.mxu0 %v2453_v5  ;;  %v2468_v5 = vld [vmem:[%s3043_s7 + $0x50] sm:$0xff]  }
 0x14f   :  { %1442 = vmatpush1.bf16.msra.mxu0 %v2451_v7  ;;  %v2470_v7 = vld [vmem:[%s3043_s7 + $0x10] sm:$0xff]  }
 0x150   :  { %1443 = vmatprep.subr.bf16.mxu0 %v2459_v9  ;;  %v2472_v9 = vld [vmem:[%s3043_s7 + $0x58] sm:$0xff]  }
 0x153   :  { %1444 = vmatpush1.bf16.msra.mxu0 %v2457_v11  ;;  %v2474_v11 = vld [vmem:[%s3043_s7 + $0x18] sm:$0xff]  }
 0x154   :  { %2207 = vmatprep.subr.bf16.mxu0 %v2461_v14  ;;  %v2477_v14 = vld [vmem:[%s3043_s7 + $0xe0] sm:$0xff]  }
 0x1d7   :  { %v714_v15 = vpop.f32.mrb[20].mxu1 }
 0x1d8   :  { %v2251_v16 = vpop.f32.mrb[21].mxu1 }
 0x1d9   :  { %v647_v17 = vpop.f32.mrb[20].mxu0  ;;  %v717_v18 = vpop.f32.mrb[22].mxu1  ;;  %v2479_v16 = vld [vmem:[%s3043_s7 + $0xa0] sm:$0xff]  }
 0x1da   :  { %v715_v19 = vadd.f32 %v714_v15, %v647_v17  ;;  %v2239_v20 = vpop.f32.mrb[21].mxu0  ;;  %v2252_v21 = vpop.f32.mrb[23].mxu1  ;;  %v2478_v15 = vld [vmem:[%s3043_s7 + $0x20] sm:$0xff]   ;;  %v2480_v17 = vld [vmem:[%s3043_s7 + $0x68] sm:$0xff]  }
 0x1db   :  { %v650_v22 = vpop.f32.mrb[22].mxu0  ;;  %v2481_v18 = vld [vmem:[%s3043_s7 + $0xe8] sm:$0xff]   ;;  %v2484_v21 = vld [vmem:[%s3043_s7 + $0x70] sm:$0xff]  }
 0x1dc   :  { %v2240_v23 = vpop.f32.mrb[23].mxu0  ;;  %v2483_v20 = vld [vmem:[%s3043_s7 + $0xa8] sm:$0xff]   ;;  %v2485_v22 = vld [vmem:[%s3043_s7 + $0xf0] sm:$0xff]  }
 0x1dd   :  { %v2486_v23 = vld [vmem:[%s3043_s7 + $0x30] sm:$0xff]  }
 0x1e7   :  { %v869_v24 = vpop.f32.mrb[24].mxu1 }
 0x1e8   :  { %v2275_v25 = vpop.f32.mrb[25].mxu1 }
 0x1e9   :  { %v790_v26 = vpop.f32.mrb[24].mxu0  ;;  %v872_v27 = vpop.f32.mrb[26].mxu1  ;;  %v2488_v25 = vld [vmem:[%s3043_s7 + $0x78] sm:$0xff]  }
 0x1ea   :  { %v796_v28 = vadd.f32 %v790_v26, %v715_v19  ;;  %v2263_v29 = vpop.f32.mrb[25].mxu0  ;;  %v2276_v30 = vpop.f32.mrb[27].mxu1  ;;  %v2482_v19 = vld [vmem:[%s3043_s7 + $0x28] sm:$0xff]   ;;  %v2489_v26 = vld [vmem:[%s3043_s7 + $0xf8] sm:$0xff]  }
 0x1eb   :  { %v793_v31 = vpop.f32.mrb[26].mxu0  ;;  %v2490_v27 = vld [vmem:[%s3043_s7 + $0x38] sm:$0xff]   ;;  %v1293_v29 = vlaneseq }
 0x1ec   :  { %v2264_v32 = vpop.f32.mrb[27].mxu0  ;;  %v875_v33 = vadd.f32 %v869_v24, %v796_v28  ;;  %v2487_v24 = vld [vmem:[%s3043_s7 + $0xb0] sm:$0xff]   ;;  %v2491_v28 = vld [vmem:[%s3043_s7 + $0xb8] sm:$0xff]  }
 0x1ed   :  { %v1294_v30 = vshrl.u32 %v1293_v29, 7 }
 0x1ef   :  { %v1295_v31 = vsub.s32 0, %v1294_v30  ;;  %v1303_v32 = vsub.s32 2, %v1294_v30 }
 0x1f7   :  { %v1025_v35 = vpop.f32.mrb[28].mxu1 }
 0x1f8   :  { %v2299_v36 = vpop.f32.mrb[29].mxu1 }
 0x1f9   :  { %v946_v37 = vpop.f32.mrb[28].mxu0  ;;  %v1028_v38 = vpop.f32.mrb[30].mxu1  ;;  %v1307_v36 = vsub.s32 3, %v1294_v30 }
 0x1fa   :  { %v952_v39 = vadd.f32 %v946_v37, %v875_v33  ;;  %v2287_v40 = vpop.f32.mrb[29].mxu0  ;;  %v2300_v41 = vpop.f32.mrb[31].mxu1  ;;  %v1291_v33 = vld [vmem:[%s3045_s6] sm:$0xf] }
 0x1fb   :  { %v949_v42 = vpop.f32.mrb[30].mxu0  ;;  %v1296_v37 = vrot.slane %v1291_v33, %v1295_v31  ;;  %v1304_v38 = vrot.slane %v1291_v33, %v1303_v32  ;;  %v1308_v40 = vrot.slane %v1291_v33, %v1307_v36 }
 0x1fc   :  { %v2288_v43 = vpop.f32.mrb[31].mxu0  ;;  %v1031_v1 = vadd.f32 %v1025_v35, %v952_v39  ;;  %v1299_v35 = vsub.s32 1, %v1294_v30 }
 0x1fe   :  { %v1300_v39 = vrot.slane %v1291_v33, %v1299_v35 }
 0x207   :  { %v1181_v44 = vpop.f32.mrb[32].mxu1 }
 0x208   :  { %v2323_v45 = vpop.f32.mrb[33].mxu1 }
 0x209   :  { %v1102_v46 = vpop.f32.mrb[32].mxu0  ;;  %v1184_v47 = vpop.f32.mrb[34].mxu1 }
 0x20a   :  { %v1108_v48 = vadd.f32 %v1102_v46, %v1031_v1  ;;  %v2311_v49 = vpop.f32.mrb[33].mxu0  ;;  %v2324_v50 = vpop.f32.mrb[35].mxu1 }
 0x20b   :  { %v1105_v51 = vpop.f32.mrb[34].mxu0 }
 0x20c   :  { %v2312_v52 = vpop.f32.mrb[35].mxu0  ;;  %v1187_v53 = vadd.f32 %v1181_v44, %v1108_v48 }
 0x219   :  { %v1258_v54 = vpop.f32.mrb[36].mxu0 }
 0x21a   :  { %v1264_v56 = vadd.f32 %v1258_v54, %v1187_v53  ;;  %v2335_v57 = vpop.f32.mrb[37].mxu0 }
 0x21b   :  { %v1261_v58 = vpop.f32.mrb[38].mxu0 }
 0x21c   :  { %v1272_v59 = vadd.f32 %v1996_v55, %v1264_v56  ;;  %v2336_v60 = vpop.f32.mrb[39].mxu0 }
 0x21e   :  { %v1273_v61 = vmax.f32 %v1272_v59, 0.0 }
 0x220   :  { %v1274_v63 = vpack.c.bf16 %v1273_v61, %v1273_v61 }
 0x222   :  { %2013 = vmatmul.mubr.msk.bf16.vlgmr.msra.gmra.mrb[36].mxu1 %vm609_vm1, %v1274_v63  ;;  %2014 = vmatmul.mubr.msk.bf16.vlgmr.msra.gmra.mrb[40].mxu0 %vm609_vm1, %v1274_v63 }
 0x223   :  { %2186 = vmatpush3.bf16.msra.mxu1 %v2462_v62  ;;  %2208 = vmatpush3.bf16.msra.mxu0 %v2463_v34  ;;  %v2015_v62 = vld [vmem:[%s3046_s8] ss:$0 sm:$0xff] }
 0x224   :  { %2187 = vmatprep.subr.bf16.mxu1 %v2464_v0  ;;  %2209 = vmatprep.subr.bf16.mxu0 %v2465_v2 }
 0x227   :  { %2188 = vmatpush3.bf16.msra.mxu1 %v2466_v3  ;;  %2210 = vmatpush3.bf16.msra.mxu0 %v2467_v4 }
 0x228   :  { %2189 = vmatprep.subr.bf16.mxu1 %v2468_v5  ;;  %2211 = vmatprep.subr.bf16.mxu0 %v2469_v6 }
 0x22b   :  { %2190 = vmatpush3.bf16.msra.mxu1 %v2470_v7  ;;  %2212 = vmatpush3.bf16.msra.mxu0 %v2471_v8 }
 0x22c   :  { %2191 = vmatprep.subr.bf16.mxu1 %v2472_v9  ;;  %2213 = vmatprep.subr.bf16.mxu0 %v2473_v10 }
 0x22f   :  { %2192 = vmatpush3.bf16.msra.mxu1 %v2474_v11  ;;  %2214 = vmatpush3.bf16.msra.mxu0 %v2475_v12 }
 0x230   :  { %2193 = vmatprep.subr.bf16.mxu1 %v2476_v13  ;;  %2215 = vmatprep.subr.bf16.mxu0 %v2477_v14 }
 0x233   :  { %2194 = vmatpush3.bf16.msra.mxu1 %v2478_v15  ;;  %2216 = vmatpush3.bf16.msra.mxu0 %v2479_v16 }
 0x234   :  { %2195 = vmatprep.subr.bf16.mxu1 %v2480_v17  ;;  %2217 = vmatprep.subr.bf16.mxu0 %v2481_v18 }
 0x237   :  { %2196 = vmatpush3.bf16.msra.mxu1 %v2482_v19  ;;  %2218 = vmatpush3.bf16.msra.mxu0 %v2483_v20 }
 0x238   :  { %2197 = vmatprep.subr.bf16.mxu1 %v2484_v21  ;;  %2219 = vmatprep.subr.bf16.mxu0 %v2485_v22 }
 0x23b   :  { %2198 = vmatpush3.bf16.msra.mxu1 %v2486_v23  ;;  %2220 = vmatpush3.bf16.msra.mxu0 %v2487_v24 }
 0x23c   :  { %2199 = vmatprep.subr.bf16.mxu1 %v2488_v25  ;;  %2221 = vmatprep.subr.bf16.mxu0 %v2489_v26 }
 0x23f   :  { %2200 = vmatpush3.bf16.msra.mxu1 %v2490_v27  ;;  %2222 = vmatpush3.bf16.msra.mxu0 %v2491_v28 }
 0x2f5   :  { %v1430_v41 = vpop.f32.mrb[36].mxu1  ;;  %v1471_v42 = vpop.f32.mrb[40].mxu0 }
 0x2f6   :  { %v1431_v43 = vadd.f32 %v1430_v41, %v1296_v37  ;;  %v1472_v1 = vadd.f32 %v1471_v42, %v1304_v38  ;;  %v1432_v44 = vpop.f32.mrb[37].mxu1  ;;  %v1473_v45 = vpop.f32.mrb[41].mxu0 }
 0x2f7   :  { %v1433_v46 = vadd.f32 %v1432_v44, %v1300_v39  ;;  %v1474_v47 = vadd.f32 %v1473_v45, %v1308_v40  ;;  %v1434_v48 = vpop.f32.mrb[38].mxu1  ;;  %v1475_v49 = vpop.f32.mrb[42].mxu0 }
 0x2f8   :  { %v1478_v50 = vmax.f32 %v1431_v43, 0.0  ;;  %v1480_v51 = vmax.f32 %v1472_v1, 0.0  ;;  %v1435_v52 = vpop.f32.mrb[39].mxu1  ;;  %v1476_v53 = vpop.f32.mrb[43].mxu0 }
 0x2f9   :  { %v1479_v54 = vmax.f32 %v1433_v46, 0.0  ;;  %v1481_v55 = vmax.f32 %v1474_v47, 0.0 }
 0x2fa   :  { %v1482_v58 = vpack.c.bf16 %v1478_v50, %v1478_v50  ;;  %v1484_v59 = vpack.c.bf16 %v1480_v51, %v1480_v51 }
 0x2fb   :  { %v1483_v56 = vpack.c.bf16 %v1479_v54, %v1479_v54  ;;  %v1485_v57 = vpack.c.bf16 %v1481_v55, %v1481_v55 }
 0x2fd   :  { %1781 = vmatprep.mubr.bf16.mxu1 %v1483_v56  ;;  %1821 = vmatprep.mubr.bf16.mxu0 %v1485_v57 }
 0x2fe   :  { %1782 = vmatmul.mubr.bf16.vlgmr.msra.gmra.mrb[40].mxu1 %v1482_v58  ;;  %1822 = vmatmul.mubr.bf16.vlgmr.msra.gmra.mrb[44].mxu0 %v1484_v59 }
 0x3d1   :  { %v2201_v60 = vpop.f32.mrb[40].mxu1  ;;  %v2223_v61 = vpop.f32.mrb[44].mxu0 }
 0x3d2   :  { %v2202_v34 = vpop.f32.mrb[41].mxu1  ;;  %v2224_v63 = vpop.f32.mrb[45].mxu0 }
 0x3d3   :  { %v2203_v0 = vadd.f32 %v2202_v34, %v2201_v60  ;;  %v2225_v2 = vadd.f32 %v2224_v63, %v2223_v61  ;;  %v2204_v3 = vpop.f32.mrb[42].mxu1  ;;  %v2226_v4 = vpop.f32.mrb[46].mxu0 }
 0x3d4   :  { %v2205_v5 = vpop.f32.mrb[43].mxu1  ;;  %v2227_v6 = vpop.f32.mrb[47].mxu0 }
 0x3d5   :  { %v1784_v7 = vadd.f32 %v2203_v0, %v2015_v62 }
 0x3d7   :  { %v1824_v8 = vadd.f32 %v2225_v2, %v1784_v7 }
 0x3d9   :  { %1829 = vst [vmem:[%s3047_s9] sm:$0xff] %v1824_v8 }

</bundles_post_ra>
